<compile_context>
chip_gen: v5e
topology: v5e:2x2
jax: 0.10.0
libtpu: 0.0.40
codegen_flags: <defaults>
</compile_context>

<pallas_src>
import jax
import jax.numpy as jnp
import numpy as np
from jax.experimental import pallas as pl
from jax.experimental.pallas import tpu as pltpu


def bottleneck_kernel(xc_ref, xp_ref, xn_ref,
                      w1_ref, b1_ref, w2_ref, b2_ref, w3_ref, b3_ref,
                      o_ref):
    _, TH, W, Cin = xc_ref.shape
    Wd = w1_ref.shape[1]
    Cout = w3_ref.shape[1]

    i = pl.program_id(1)
    nrb = pl.num_programs(1)

    x_cur = xc_ref[0]            # (TH, W, Cin)  bf16, current row block
    x_prev = xp_ref[0]           # (1, W, Cin)   bf16, row above (halo, clamped)
    x_next = xn_ref[0]           # (1, W, Cin)   bf16, row below (halo, clamped)

    w1 = w1_ref[...]             # (Cin, Wd)      bf16 (BN scale folded)
    b1 = b1_ref[...]             # (1, Wd)        f32
    w2 = w2_ref[...]             # (3, 3*Wd, Wd)  bf16, dy-grouped im2col layout
    b2 = b2_ref[...]             # (1, Wd)        f32
    w3 = w3_ref[...]             # (Wd, Cout)     bf16
    b3 = b3_ref[...]             # (1, Cout)      f32

    # ---- conv1 (1x1, BN folded) + bias + ReLU: bf16 MXU, f32 accumulate ----
    def conv1(x3d):
        r = x3d.shape[0] * x3d.shape[1]
        h = jnp.dot(x3d.reshape(r, Cin), w1, preferred_element_type=jnp.float32)
        return jnp.maximum(h + b1, 0.0)

    h1_cur = conv1(x_cur).reshape(TH, W, Wd)
    h1_prev = conv1(x_prev).reshape(1, W, Wd)
    h1_next = conv1(x_next).reshape(1, W, Wd)

    # conv2's zero padding acts on h1, so at the image boundary the halo rows
    # must be exactly zero (not conv1(clamped row)).  Only the two 1-row halos
    # are touched (scalar-predicated multiply), not the whole tile.
    h1_prev = h1_prev * (i != 0).astype(jnp.float32)
    h1_next = h1_next * (i != nrb - 1).astype(jnp.float32)

    h1e = jnp.concatenate(
        [h1_prev.astype(jnp.bfloat16),
         h1_cur.astype(jnp.bfloat16),
         h1_next.astype(jnp.bfloat16)], axis=0)          # (TH+2, W, Wd) bf16

    # ---- conv2 (3x3, stride 1, pad 1): 3 dy-grouped matmuls, K = 3*Wd ------
    zcol = jnp.zeros((TH, 1, Wd), jnp.bfloat16)
    acc = jnp.zeros((TH * W, Wd), jnp.float32)
    for dy in range(3):                                   # static, unrolled
        rows = h1e[dy:dy + TH]                            # (TH, W, Wd)
        rows_p = jnp.concatenate([zcol, rows, zcol], axis=1)    # (TH, W+2, Wd)
        taps = jnp.concatenate([rows_p[:, dx:dx + W, :] for dx in range(3)],
                               axis=-1)                   # (TH, W, 3*Wd)
        acc = acc + jnp.dot(taps.reshape(TH * W, 3 * Wd), w2[dy],
                            preferred_element_type=jnp.float32)
    h2 = jnp.maximum(acc + b2, 0.0).astype(jnp.bfloat16)  # (TH*W, Wd)

    # ---- conv3 (1x1, BN folded) + identity residual + ReLU -----------------
    h3 = jnp.dot(h2, w3, preferred_element_type=jnp.float32) + b3
    identity = x_cur.reshape(TH * W, Cin).astype(jnp.float32)
    out = jnp.maximum(h3 + identity, 0.0)

    o_ref[...] = out.reshape(1, TH, W, Cout).astype(o_ref.dtype)


def _vmem_capacity_bytes():
    """Physical VMEM of the current TPU generation; conservative fallback."""
    try:
        info = pltpu.get_tpu_info()
        cap = getattr(info, "vmem_capacity_bytes", None)
        if cap:
            return int(cap)
    except Exception:
        pass
    return 64 << 20        # v7x-sized fallback (safe on every generation)


def _pick_block_h(N, H, W, Cin, Wd, Cout, vmem_cap):
    """Largest divisor of H whose working set fits a generation-aware budget."""
    # Per-output-row working set (bf16 activations, f32 accumulators),
    # counting double-buffering of the pipelined x / out tiles.
    per_row = W * (
        2 * 2 * Cin            # x tile, bf16, 2 pipeline buffers
        + 2 * 4 * Cout         # out tile, f32, 2 pipeline buffers
        + 4 * Wd + 2 * Wd      # h1 (f32) + halo-extended bf16 copy
        + 2 * 3 * Wd           # one dy group of dx taps (bf16)
        + 4 * Wd + 4 * Wd      # conv2 f32 accumulator + h2
        + 4 * Cout             # h3 (f32)
    )
    # Resident weights (bf16, double-buffered) + biases (f32, double-buffered).
    fixed = 2 * 2 * (Cin * Wd + 9 * Wd * Wd + Wd * Cout) + 2 * 4 * (2 * Wd + Cout)
    budget = max(int(vmem_cap * 0.45) - fixed, per_row)
    max_rows = max(1, budget // max(per_row, 1))
    th = 1
    for d in range(1, H + 1):
        if H % d == 0 and d <= max_rows:
            th = d
    # Keep at least two grid steps so both v7x TensorCores get work.
    while N * (H // th) < 2 and th > 1:
        th = max(d for d in range(1, th) if H % d == 0)
    return th


def bottleneck_pallas(x_nhwc, w1, s1, b1, w2_hwio, s2, b2, w3, s3, b3,
                      *, block_h=None):
    N, H, W, Cin = x_nhwc.shape
    Wd = w1.shape[1]
    Cout = w3.shape[1]
    # downsample=None -> identity shortcut -> channel counts must match.
    assert Cin == Cout, (
        "identity residual requires inplanes == planes*expansion "
        "(Bottleneck with downsample=None)")

    vmem_cap = _vmem_capacity_bytes()
    if block_h is None:
        block_h = _pick_block_h(N, H, W, Cin, Wd, Cout, vmem_cap)
    TH = int(block_h)
    # TODO(synk): ragged H (cdiv grid + in-kernel row masking) not implemented;
    # ResNet/DetNet stages (H in {56, 28, 14, 7}) always have a usable divisor.
    assert H % TH == 0, f"block_h={TH} must divide H={H}"

    # ---- fold BN (inference form) into conv weights; cast to bf16 ----------
    w1f = (w1 * s1.reshape(1, -1)).astype(jnp.bfloat16)                # (Cin, Wd)
    w2f = (w2_hwio * s2.reshape(1, 1, 1, -1))
    w2f = w2f.reshape(3, 3 * Wd, Wd).astype(jnp.bfloat16)             # dy-grouped
    w3f = (w3 * s3.reshape(1, -1)).astype(jnp.bfloat16)               # (Wd, Cout)
    b1v = b1.reshape(1, Wd).astype(jnp.float32)
    b2v = b2.reshape(1, Wd).astype(jnp.float32)
    b3v = b3.reshape(1, Cout).astype(jnp.float32)
    x_bf = x_nhwc.astype(jnp.bfloat16)

    grid = (N, H // TH)

    wmap2 = lambda n, i: (0, 0)      # weights / biases stay VMEM-resident
    wmap3 = lambda n, i: (0, 0, 0)

    in_specs = [
        # current row block of x
        pl.BlockSpec((1, TH, W, Cin), lambda n, i: (n, i, 0, 0)),
        # 1-row halo above (clamped at the top edge; zeroed in-kernel)
        pl.BlockSpec((1, 1, W, Cin),
                     lambda n, i: (n, jnp.maximum(i * TH - 1, 0), 0, 0)),
        # 1-row halo below (clamped at the bottom edge; zeroed in-kernel)
        pl.BlockSpec((1, 1, W, Cin),
                     lambda n, i: (n, jnp.minimum((i + 1) * TH, H - 1), 0, 0)),
        pl.BlockSpec((Cin, Wd), wmap2),
        pl.BlockSpec((1, Wd), wmap2),
        pl.BlockSpec((3, 3 * Wd, Wd), wmap3),
        pl.BlockSpec((1, Wd), wmap2),
        pl.BlockSpec((Wd, Cout), wmap2),
        pl.BlockSpec((1, Cout), wmap2),
    ]
    out_spec = pl.BlockSpec((1, TH, W, Cout), lambda n, i: (n, i, 0, 0))

    rows = N * H * W
    halo_rows = N * (H // TH) * 2 * W
    flops = (2 * rows * (Cin * Wd + 9 * Wd * Wd + Wd * Cout)
             + 2 * halo_rows * Cin * Wd)                   # conv1 halo recompute
    bytes_accessed = (2 * (int(x_bf.size) + halo_rows * Cin)   # bf16 x (+halos)
                      + 4 * rows * Cout                        # f32 output
                      + 2 * (int(w1f.size) + int(w2f.size) + int(w3f.size))
                      + 4 * (int(b1v.size) + int(b2v.size) + int(b3v.size)))

    # Generation-aware scoped-VMEM limit: ~96 MiB on v5e/v6e (128 MiB VMEM),
    # ~48 MiB on v7x (64 MiB VMEM).
    vmem_limit = max(32 << 20, min(int(vmem_cap * 3 // 4), 100 << 20))

    return pl.pallas_call(
        bottleneck_kernel,
        out_shape=jax.ShapeDtypeStruct((N, H, W, Cout), jnp.float32),
        grid_spec=pltpu.PrefetchScalarGridSpec(
            num_scalar_prefetch=0,
            grid=grid,
            in_specs=in_specs,
            out_specs=out_spec),
        compiler_params=pltpu.CompilerParams(
            dimension_semantics=("parallel", "parallel"),
            vmem_limit_bytes=vmem_limit),
        cost_estimate=pl.CostEstimate(
            flops=int(flops), transcendentals=0,
            bytes_accessed=int(bytes_accessed)),
    )(x_bf, x_bf, x_bf, w1f, b1v, w2f, b2v, w3f, b3v)


def bottleneck_ref(x_nhwc, w1, s1, b1, w2_hwio, s2, b2, w3, s3, b3):
    """Pure-JAX f32 reference (same NHWC layout, un-folded BN scale/bias)."""
    def c1x1(x, w):
        return jnp.einsum('nhwc,cd->nhwd', x, w)
    h = jnp.maximum(c1x1(x_nhwc, w1) * s1 + b1, 0.0)
    h = jax.lax.conv_general_dilated(
        h, w2_hwio, window_strides=(1, 1), padding='SAME',
        dimension_numbers=('NHWC', 'HWIO', 'NHWC'))
    h = jnp.maximum(h * s2 + b2, 0.0)
    h = c1x1(h, w3) * s3 + b3
    return jnp.maximum(h + x_nhwc, 0.0)


def fold_bn(gamma, beta, mean, var, eps=1e-5):
    scale = gamma / jnp.sqrt(var + eps)
    bias = beta - mean * scale
    return scale[None, :], bias[None, :]   # (1, C) for broadcasting


if __name__ == "__main__":
    # Module-consistent small shapes:
    #   inplanes = 16, planes = 4, expansion = 4 -> width = 4, out channels = 16
    N, H, W = 2, 16, 16
    inplanes, planes = 16, 4
    width = planes          # base_width=64, groups=1 -> width = planes
    cout = planes * 4       # expansion = 4

    key = jax.random.PRNGKey(0)
    ks = jax.random.split(key, 8)

    x = jax.random.normal(ks[0], (N, H, W, inplanes), jnp.float32)

    # Conv weights (matmul-friendly layouts): conv1x1 as (Cin, Cout); conv3x3 as HWIO.
    w1 = jax.random.normal(ks[1], (inplanes, width), jnp.float32) * 0.2
    w2 = jax.random.normal(ks[2], (3, 3, width, width), jnp.float32) * 0.2
    w3 = jax.random.normal(ks[3], (width, cout), jnp.float32) * 0.2

    # Deterministic BatchNorm parameters (inference mode), folded to scale/bias.
    def bn_params(k, c):
        k1, k2, k3, k4 = jax.random.split(k, 4)
        gamma = 0.5 + jax.random.uniform(k1, (c,), jnp.float32)
        beta = jax.random.normal(k2, (c,), jnp.float32) * 0.1
        mean = jax.random.normal(k3, (c,), jnp.float32) * 0.1
        var = 0.5 + jax.random.uniform(k4, (c,), jnp.float32)
        return fold_bn(gamma, beta, mean, var)

    s1, b1 = bn_params(ks[4], width)
    s2, b2 = bn_params(ks[5], width)
    s3, b3 = bn_params(ks[6], cout)

    ref = bottleneck_ref(x, w1, s1, b1, w2, s2, b2, w3, s3, b3)

    # block_h=8 -> grid (2, 2): exercises the halo / boundary-zeroing path.
    out_a = bottleneck_pallas(x, w1, s1, b1, w2, s2, b2, w3, s3, b3, block_h=8)
    out_a = jax.block_until_ready(out_a)
    np.testing.assert_allclose(np.asarray(out_a), np.asarray(ref),
                               rtol=5e-2, atol=5e-2)

    # Auto (generation-aware) row-block pick -> typically the whole image here.
    out_b = bottleneck_pallas(x, w1, s1, b1, w2, s2, b2, w3, s3, b3)
    out_b = jax.block_until_ready(out_b)
    np.testing.assert_allclose(np.asarray(out_b), np.asarray(ref),
                               rtol=5e-2, atol=5e-2)

    print("KERNEL_OK")
</pallas_src>

<mosaic_0001>
module attributes {stable_mosaic.version = 11 : i64} {
  func.func @bottleneck_kernel(%arg0: i32, %arg1: i32, %arg2: memref<1x8x16x16xbf16, #tpu.memory_space<vmem>>, %arg3: memref<1x1x16x16xbf16, #tpu.memory_space<vmem>>, %arg4: memref<1x1x16x16xbf16, #tpu.memory_space<vmem>>, %arg5: memref<16x4xbf16, #tpu.memory_space<vmem>>, %arg6: memref<1x4xf32, #tpu.memory_space<vmem>>, %arg7: memref<3x12x4xbf16, #tpu.memory_space<vmem>>, %arg8: memref<1x4xf32, #tpu.memory_space<vmem>>, %arg9: memref<4x16xbf16, #tpu.memory_space<vmem>>, %arg10: memref<1x16xf32, #tpu.memory_space<vmem>>, %arg11: memref<1x8x16x16xf32, #tpu.memory_space<vmem>>) attributes {dimension_semantics = [#tpu.dimension_semantics<parallel>, #tpu.dimension_semantics<parallel>], iteration_bounds = array<i64: 2, 2>, scalar_prefetch = 0 : i64, scratch_operands = 0 : i64, tpu.core_type = #tpu.core_type<tc>, window_params = [{transform_indices = @transform_0, window_bounds = array<i64: 1, 8, 16, 16>}, {transform_indices = @transform_1, window_bounds = array<i64: 1, 1, 16, 16>}, {transform_indices = @transform_2, window_bounds = array<i64: 1, 1, 16, 16>}, {pipeline_mode = #tpu.pipeline_mode<synchronous>, transform_indices = @transform_3, window_bounds = array<i64: 16, 4>}, {pipeline_mode = #tpu.pipeline_mode<synchronous>, transform_indices = @transform_4, window_bounds = array<i64: 1, 4>}, {pipeline_mode = #tpu.pipeline_mode<synchronous>, transform_indices = @transform_5, window_bounds = array<i64: 3, 12, 4>}, {pipeline_mode = #tpu.pipeline_mode<synchronous>, transform_indices = @transform_6, window_bounds = array<i64: 1, 4>}, {pipeline_mode = #tpu.pipeline_mode<synchronous>, transform_indices = @transform_7, window_bounds = array<i64: 4, 16>}, {pipeline_mode = #tpu.pipeline_mode<synchronous>, transform_indices = @transform_8, window_bounds = array<i64: 1, 16>}, {transform_indices = @transform_9, window_bounds = array<i64: 1, 8, 16, 16>}]} {
    %c0 = arith.constant 0 : index
    %c0_0 = arith.constant 0 : index
    %c0_1 = arith.constant 0 : index
    %c0_2 = arith.constant 0 : index
    %0 = vector.load %arg2[%c0, %c0_0, %c0_1, %c0_2] : memref<1x8x16x16xbf16, #tpu.memory_space<vmem>>, vector<1x8x16x16xbf16>
    %1 = vector.shape_cast %0 : vector<1x8x16x16xbf16> to vector<8x16x16xbf16>
    %c0_3 = arith.constant 0 : index
    %c0_4 = arith.constant 0 : index
    %c0_5 = arith.constant 0 : index
    %c0_6 = arith.constant 0 : index
    %2 = vector.load %arg3[%c0_3, %c0_4, %c0_5, %c0_6] : memref<1x1x16x16xbf16, #tpu.memory_space<vmem>>, vector<1x1x16x16xbf16>
    %3 = vector.shape_cast %2 : vector<1x1x16x16xbf16> to vector<1x16x16xbf16>
    %c0_7 = arith.constant 0 : index
    %c0_8 = arith.constant 0 : index
    %c0_9 = arith.constant 0 : index
    %c0_10 = arith.constant 0 : index
    %4 = vector.load %arg4[%c0_7, %c0_8, %c0_9, %c0_10] : memref<1x1x16x16xbf16, #tpu.memory_space<vmem>>, vector<1x1x16x16xbf16>
    %5 = vector.shape_cast %4 : vector<1x1x16x16xbf16> to vector<1x16x16xbf16>
    %c0_11 = arith.constant 0 : index
    %c0_12 = arith.constant 0 : index
    %6 = vector.load %arg5[%c0_11, %c0_12] : memref<16x4xbf16, #tpu.memory_space<vmem>>, vector<16x4xbf16>
    %c0_13 = arith.constant 0 : index
    %c0_14 = arith.constant 0 : index
    %7 = vector.load %arg6[%c0_13, %c0_14] : memref<1x4xf32, #tpu.memory_space<vmem>>, vector<1x4xf32>
    %c0_15 = arith.constant 0 : index
    %c0_16 = arith.constant 0 : index
    %c0_17 = arith.constant 0 : index
    %8 = vector.load %arg7[%c0_15, %c0_16, %c0_17] : memref<3x12x4xbf16, #tpu.memory_space<vmem>>, vector<3x12x4xbf16>
    %c0_18 = arith.constant 0 : index
    %c0_19 = arith.constant 0 : index
    %9 = vector.load %arg8[%c0_18, %c0_19] : memref<1x4xf32, #tpu.memory_space<vmem>>, vector<1x4xf32>
    %c0_20 = arith.constant 0 : index
    %c0_21 = arith.constant 0 : index
    %10 = vector.load %arg9[%c0_20, %c0_21] : memref<4x16xbf16, #tpu.memory_space<vmem>>, vector<4x16xbf16>
    %c0_22 = arith.constant 0 : index
    %c0_23 = arith.constant 0 : index
    %11 = vector.load %arg10[%c0_22, %c0_23] : memref<1x16xf32, #tpu.memory_space<vmem>>, vector<1x16xf32>
    %12 = vector.shape_cast %1 : vector<8x16x16xbf16> to vector<128x16xbf16>
    %cst = arith.constant dense<0.000000e+00> : vector<128x4xf32>
    %13 = tpu.matmul %12, %6, %cst {dimension_numbers = #tpu.dot_dimension_numbers<[1], [0], [0], [1], [0, 0, 1, 1], [], []>} : vector<128x16xbf16>, vector<16x4xbf16>, vector<128x4xf32> -> vector<128x4xf32>
    %14 = vector.broadcast %7 : vector<1x4xf32> to vector<128x4xf32>
    %15 = arith.addf %13, %14 : vector<128x4xf32>
    %cst_24 = arith.constant 0.000000e+00 : f32
    %16 = vector.broadcast %cst_24 : f32 to vector<128x4xf32>
    %17 = arith.maximumf %15, %16 : vector<128x4xf32>
    %18 = vector.shape_cast %17 : vector<128x4xf32> to vector<8x16x4xf32>
    %19 = vector.shape_cast %3 : vector<1x16x16xbf16> to vector<16x16xbf16>
    %cst_25 = arith.constant dense<0.000000e+00> : vector<16x4xf32>
    %20 = tpu.matmul %19, %6, %cst_25 {dimension_numbers = #tpu.dot_dimension_numbers<[1], [0], [0], [1], [0, 0, 1, 1], [], []>} : vector<16x16xbf16>, vector<16x4xbf16>, vector<16x4xf32> -> vector<16x4xf32>
    %21 = vector.broadcast %7 : vector<1x4xf32> to vector<16x4xf32>
    %22 = arith.addf %20, %21 : vector<16x4xf32>
    %cst_26 = arith.constant 0.000000e+00 : f32
    %23 = vector.broadcast %cst_26 : f32 to vector<16x4xf32>
    %24 = arith.maximumf %22, %23 : vector<16x4xf32>
    %25 = vector.shape_cast %24 : vector<16x4xf32> to vector<1x16x4xf32>
    %26 = vector.shape_cast %5 : vector<1x16x16xbf16> to vector<16x16xbf16>
    %cst_27 = arith.constant dense<0.000000e+00> : vector<16x4xf32>
    %27 = tpu.matmul %26, %6, %cst_27 {dimension_numbers = #tpu.dot_dimension_numbers<[1], [0], [0], [1], [0, 0, 1, 1], [], []>} : vector<16x16xbf16>, vector<16x4xbf16>, vector<16x4xf32> -> vector<16x4xf32>
    %28 = vector.broadcast %7 : vector<1x4xf32> to vector<16x4xf32>
    %29 = arith.addf %27, %28 : vector<16x4xf32>
    %cst_28 = arith.constant 0.000000e+00 : f32
    %30 = vector.broadcast %cst_28 : f32 to vector<16x4xf32>
    %31 = arith.maximumf %29, %30 : vector<16x4xf32>
    %32 = vector.shape_cast %31 : vector<16x4xf32> to vector<1x16x4xf32>
    %c0_i32 = arith.constant 0 : i32
    %33 = arith.cmpi ne, %arg1, %c0_i32 : i32
    %34 = arith.extui %33 : i1 to i32
    %35 = arith.sitofp %34 : i32 to f32
    %36 = vector.broadcast %35 : f32 to vector<1x16x4xf32>
    %37 = arith.mulf %25, %36 : vector<1x16x4xf32>
    %c1_i32 = arith.constant 1 : i32
    %38 = arith.cmpi ne, %arg1, %c1_i32 : i32
    %39 = arith.extui %38 : i1 to i32
    %40 = arith.sitofp %39 : i32 to f32
    %41 = vector.broadcast %40 : f32 to vector<1x16x4xf32>
    %42 = arith.mulf %32, %41 : vector<1x16x4xf32>
    %43 = arith.truncf %37 : vector<1x16x4xf32> to vector<1x16x4xbf16>
    %44 = arith.truncf %18 : vector<8x16x4xf32> to vector<8x16x4xbf16>
    %45 = arith.truncf %42 : vector<1x16x4xf32> to vector<1x16x4xbf16>
    %46 = tpu.concatenate %43, %44, %45 in 0 : vector<1x16x4xbf16>, vector<8x16x4xbf16>, vector<1x16x4xbf16> -> vector<10x16x4xbf16>
    %cst_29 = arith.constant 0.000000e+00 : bf16
    %47 = vector.broadcast %cst_29 : bf16 to vector<8x1x4xbf16>
    %cst_30 = arith.constant 0.000000e+00 : f32
    %48 = vector.broadcast %cst_30 : f32 to vector<128x4xf32>
    %49 = vector.extract_strided_slice %46 {offsets = [0, 0, 0], sizes = [8, 16, 4], strides = [1, 1, 1]} : vector<10x16x4xbf16> to vector<8x16x4xbf16>
    %50 = tpu.concatenate %47, %49, %47 in 1 : vector<8x1x4xbf16>, vector<8x16x4xbf16>, vector<8x1x4xbf16> -> vector<8x18x4xbf16>
    %51 = vector.extract_strided_slice %50 {offsets = [0, 0, 0], sizes = [8, 16, 4], strides = [1, 1, 1]} : vector<8x18x4xbf16> to vector<8x16x4xbf16>
    %52 = vector.extract_strided_slice %50 {offsets = [0, 1, 0], sizes = [8, 16, 4], strides = [1, 1, 1]} : vector<8x18x4xbf16> to vector<8x16x4xbf16>
    %53 = vector.extract_strided_slice %50 {offsets = [0, 2, 0], sizes = [8, 16, 4], strides = [1, 1, 1]} : vector<8x18x4xbf16> to vector<8x16x4xbf16>
    %54 = tpu.concatenate %51, %52, %53 in 2 : vector<8x16x4xbf16>, vector<8x16x4xbf16>, vector<8x16x4xbf16> -> vector<8x16x12xbf16>
    %55 = vector.shape_cast %54 : vector<8x16x12xbf16> to vector<128x12xbf16>
    %56 = vector.extract_strided_slice %8 {offsets = [0, 0, 0], sizes = [1, 12, 4], strides = [1, 1, 1]} : vector<3x12x4xbf16> to vector<1x12x4xbf16>
    %57 = vector.shape_cast %56 : vector<1x12x4xbf16> to vector<12x4xbf16>
    %cst_31 = arith.constant dense<0.000000e+00> : vector<128x4xf32>
    %58 = tpu.matmul %55, %57, %cst_31 {dimension_numbers = #tpu.dot_dimension_numbers<[1], [0], [0], [1], [0, 0, 1, 1], [], []>} : vector<128x12xbf16>, vector<12x4xbf16>, vector<128x4xf32> -> vector<128x4xf32>
    %59 = arith.addf %48, %58 : vector<128x4xf32>
    %60 = vector.extract_strided_slice %46 {offsets = [1, 0, 0], sizes = [8, 16, 4], strides = [1, 1, 1]} : vector<10x16x4xbf16> to vector<8x16x4xbf16>
    %61 = tpu.concatenate %47, %60, %47 in 1 : vector<8x1x4xbf16>, vector<8x16x4xbf16>, vector<8x1x4xbf16> -> vector<8x18x4xbf16>
    %62 = vector.extract_strided_slice %61 {offsets = [0, 0, 0], sizes = [8, 16, 4], strides = [1, 1, 1]} : vector<8x18x4xbf16> to vector<8x16x4xbf16>
    %63 = vector.extract_strided_slice %61 {offsets = [0, 1, 0], sizes = [8, 16, 4], strides = [1, 1, 1]} : vector<8x18x4xbf16> to vector<8x16x4xbf16>
    %64 = vector.extract_strided_slice %61 {offsets = [0, 2, 0], sizes = [8, 16, 4], strides = [1, 1, 1]} : vector<8x18x4xbf16> to vector<8x16x4xbf16>
    %65 = tpu.concatenate %62, %63, %64 in 2 : vector<8x16x4xbf16>, vector<8x16x4xbf16>, vector<8x16x4xbf16> -> vector<8x16x12xbf16>
    %66 = vector.shape_cast %65 : vector<8x16x12xbf16> to vector<128x12xbf16>
    %67 = vector.extract_strided_slice %8 {offsets = [1, 0, 0], sizes = [1, 12, 4], strides = [1, 1, 1]} : vector<3x12x4xbf16> to vector<1x12x4xbf16>
    %68 = vector.shape_cast %67 : vector<1x12x4xbf16> to vector<12x4xbf16>
    %cst_32 = arith.constant dense<0.000000e+00> : vector<128x4xf32>
    %69 = tpu.matmul %66, %68, %cst_32 {dimension_numbers = #tpu.dot_dimension_numbers<[1], [0], [0], [1], [0, 0, 1, 1], [], []>} : vector<128x12xbf16>, vector<12x4xbf16>, vector<128x4xf32> -> vector<128x4xf32>
    %70 = arith.addf %59, %69 : vector<128x4xf32>
    %71 = vector.extract_strided_slice %46 {offsets = [2, 0, 0], sizes = [8, 16, 4], strides = [1, 1, 1]} : vector<10x16x4xbf16> to vector<8x16x4xbf16>
    %72 = tpu.concatenate %47, %71, %47 in 1 : vector<8x1x4xbf16>, vector<8x16x4xbf16>, vector<8x1x4xbf16> -> vector<8x18x4xbf16>
    %73 = vector.extract_strided_slice %72 {offsets = [0, 0, 0], sizes = [8, 16, 4], strides = [1, 1, 1]} : vector<8x18x4xbf16> to vector<8x16x4xbf16>
    %74 = vector.extract_strided_slice %72 {offsets = [0, 1, 0], sizes = [8, 16, 4], strides = [1, 1, 1]} : vector<8x18x4xbf16> to vector<8x16x4xbf16>
    %75 = vector.extract_strided_slice %72 {offsets = [0, 2, 0], sizes = [8, 16, 4], strides = [1, 1, 1]} : vector<8x18x4xbf16> to vector<8x16x4xbf16>
    %76 = tpu.concatenate %73, %74, %75 in 2 : vector<8x16x4xbf16>, vector<8x16x4xbf16>, vector<8x16x4xbf16> -> vector<8x16x12xbf16>
    %77 = vector.shape_cast %76 : vector<8x16x12xbf16> to vector<128x12xbf16>
    %78 = vector.extract_strided_slice %8 {offsets = [2, 0, 0], sizes = [1, 12, 4], strides = [1, 1, 1]} : vector<3x12x4xbf16> to vector<1x12x4xbf16>
    %79 = vector.shape_cast %78 : vector<1x12x4xbf16> to vector<12x4xbf16>
    %cst_33 = arith.constant dense<0.000000e+00> : vector<128x4xf32>
    %80 = tpu.matmul %77, %79, %cst_33 {dimension_numbers = #tpu.dot_dimension_numbers<[1], [0], [0], [1], [0, 0, 1, 1], [], []>} : vector<128x12xbf16>, vector<12x4xbf16>, vector<128x4xf32> -> vector<128x4xf32>
    %81 = arith.addf %70, %80 : vector<128x4xf32>
    %82 = vector.broadcast %9 : vector<1x4xf32> to vector<128x4xf32>
    %83 = arith.addf %81, %82 : vector<128x4xf32>
    %cst_34 = arith.constant 0.000000e+00 : f32
    %84 = vector.broadcast %cst_34 : f32 to vector<128x4xf32>
    %85 = arith.maximumf %83, %84 : vector<128x4xf32>
    %86 = arith.truncf %85 : vector<128x4xf32> to vector<128x4xbf16>
    %cst_35 = arith.constant dense<0.000000e+00> : vector<128x16xf32>
    %87 = tpu.matmul %86, %10, %cst_35 {dimension_numbers = #tpu.dot_dimension_numbers<[1], [0], [0], [1], [0, 0, 1, 1], [], []>} : vector<128x4xbf16>, vector<4x16xbf16>, vector<128x16xf32> -> vector<128x16xf32>
    %88 = vector.broadcast %11 : vector<1x16xf32> to vector<128x16xf32>
    %89 = arith.addf %87, %88 : vector<128x16xf32>
    %90 = vector.shape_cast %1 : vector<8x16x16xbf16> to vector<128x16xbf16>
    %91 = arith.extf %90 : vector<128x16xbf16> to vector<128x16xf32>
    %92 = arith.addf %89, %91 : vector<128x16xf32>
    %cst_36 = arith.constant 0.000000e+00 : f32
    %93 = vector.broadcast %cst_36 : f32 to vector<128x16xf32>
    %94 = arith.maximumf %92, %93 : vector<128x16xf32>
    %95 = vector.shape_cast %94 : vector<128x16xf32> to vector<1x8x16x16xf32>
    %c0_37 = arith.constant 0 : index
    %c0_38 = arith.constant 0 : index
    %c0_39 = arith.constant 0 : index
    %c0_40 = arith.constant 0 : index
    %96 = vector.load %arg11[%c0_37, %c0_38, %c0_39, %c0_40] : memref<1x8x16x16xf32, #tpu.memory_space<vmem>>, vector<1x8x16x16xf32>
    tpu.vector_store %arg11[%c0_37, %c0_38, %c0_39, %c0_40], %95 {strides = array<i32>} : memref<1x8x16x16xf32, #tpu.memory_space<vmem>>, vector<1x8x16x16xf32>,
    return
  }
  func.func @transform_0(%arg0: i32, %arg1: i32) -> (i32, i32, i32, i32) {
    %c0_i32 = arith.constant 0 : i32
    %c0_i32_0 = arith.constant 0 : i32
    %c0_i32_1 = arith.constant 0 : i32
    return %arg0, %arg1, %c0_i32, %c0_i32_0 : i32, i32, i32, i32
  }
  func.func @transform_1(%arg0: i32, %arg1: i32) -> (i32, i32, i32, i32) {
    %c8_i32 = arith.constant 8 : i32
    %0 = arith.muli %arg1, %c8_i32 : i32
    %c1_i32 = arith.constant 1 : i32
    %1 = arith.subi %0, %c1_i32 : i32
    %c0_i32 = arith.constant 0 : i32
    %2 = arith.maxsi %1, %c0_i32 : i32
    %c0_i32_0 = arith.constant 0 : i32
    %c0_i32_1 = arith.constant 0 : i32
    %c0_i32_2 = arith.constant 0 : i32
    return %arg0, %2, %c0_i32_0, %c0_i32_1 : i32, i32, i32, i32
  }
  func.func @transform_2(%arg0: i32, %arg1: i32) -> (i32, i32, i32, i32) {
    %c1_i32 = arith.constant 1 : i32
    %0 = arith.addi %arg1, %c1_i32 : i32
    %c8_i32 = arith.constant 8 : i32
    %1 = arith.muli %0, %c8_i32 : i32
    %c15_i32 = arith.constant 15 : i32
    %2 = arith.minsi %1, %c15_i32 : i32
    %c0_i32 = arith.constant 0 : i32
    %c0_i32_0 = arith.constant 0 : i32
    %c0_i32_1 = arith.constant 0 : i32
    return %arg0, %2, %c0_i32, %c0_i32_0 : i32, i32, i32, i32
  }
  func.func @transform_3(%arg0: i32, %arg1: i32) -> (i32, i32) {
    %c0_i32 = arith.constant 0 : i32
    %c0_i32_0 = arith.constant 0 : i32
    %c0_i32_1 = arith.constant 0 : i32
    return %c0_i32, %c0_i32_0 : i32, i32
  }
  func.func @transform_4(%arg0: i32, %arg1: i32) -> (i32, i32) {
    %c0_i32 = arith.constant 0 : i32
    %c0_i32_0 = arith.constant 0 : i32
    %c0_i32_1 = arith.constant 0 : i32
    return %c0_i32, %c0_i32_0 : i32, i32
  }
  func.func @transform_5(%arg0: i32, %arg1: i32) -> (i32, i32, i32) {
    %c0_i32 = arith.constant 0 : i32
    %c0_i32_0 = arith.constant 0 : i32
    %c0_i32_1 = arith.constant 0 : i32
    %c0_i32_2 = arith.constant 0 : i32
    return %c0_i32, %c0_i32_0, %c0_i32_1 : i32, i32, i32
  }
  func.func @transform_6(%arg0: i32, %arg1: i32) -> (i32, i32) {
    %c0_i32 = arith.constant 0 : i32
    %c0_i32_0 = arith.constant 0 : i32
    %c0_i32_1 = arith.constant 0 : i32
    return %c0_i32, %c0_i32_0 : i32, i32
  }
  func.func @transform_7(%arg0: i32, %arg1: i32) -> (i32, i32) {
    %c0_i32 = arith.constant 0 : i32
    %c0_i32_0 = arith.constant 0 : i32
    %c0_i32_1 = arith.constant 0 : i32
    return %c0_i32, %c0_i32_0 : i32, i32
  }
  func.func @transform_8(%arg0: i32, %arg1: i32) -> (i32, i32) {
    %c0_i32 = arith.constant 0 : i32
    %c0_i32_0 = arith.constant 0 : i32
    %c0_i32_1 = arith.constant 0 : i32
    return %c0_i32, %c0_i32_0 : i32, i32
  }
  func.func @transform_9(%arg0: i32, %arg1: i32) -> (i32, i32, i32, i32) {
    %c0_i32 = arith.constant 0 : i32
    %c0_i32_0 = arith.constant 0 : i32
    %c0_i32_1 = arith.constant 0 : i32
    return %arg0, %arg1, %c0_i32, %c0_i32_0 : i32, i32, i32, i32
  }
}

</mosaic_0001>

<bundles_post_ra>
// kernel: tpu_custom_call.1
= control target key start
LH: loop header
LB: loop body
LE: loop exit
PB: predicated region body
PF: predicated region fallthrough
CT: control target
= control target key end

     0   :  { %s3068_s0 = inlined_call_operand.hbm [shape: bf16[2,16,16,16], index: 0, kind: input, shape index: {}]   ;;  %s3069_s1 = inlined_call_operand.hbm [shape: bf16[2,16,16,16], index: 1, kind: input, shape index: {}]   ;;  %s3070_s2 = inlined_call_operand.hbm [shape: bf16[2,16,16,16], index: 2, kind: input, shape index: {}]   ;;  %s3071_s3 = inlined_call_operand.vmem [shape: bf16[16,4], index: 3, kind: input, shape index: {}]   ;;  %s3072_s4 = inlined_call_operand.vmem [shape: f32[1,4], index: 4, kind: input, shape index: {}]   ;;  %s3073_s5 = inlined_call_operand.vmem [shape: bf16[3,12,4], index: 5, kind: input, shape index: {}]   ;;  %s3074_s6 = inlined_call_operand.vmem [shape: f32[1,4], index: 6, kind: input, shape index: {}]   ;;  %s3075_s7 = inlined_call_operand.vmem [shape: bf16[4,16], index: 7, kind: input, shape index: {}]   ;;  %s3076_s8 = inlined_call_operand.vmem [shape: f32[1,16], index: 8, kind: input, shape index: {}]   ;;  %s3077_s9 = inlined_call_operand.hbm [shape: f32[2,16,16,16], index: 9, kind: output, shape index: {}]  }
   0x1   :  { %3096 = sst [smem:[#allocation26_spill]] %s3068_s0 }
   0x2   :  { %3097 = sst [smem:[#allocation27_spill]] %s3069_s1 }
   0x3   :  { %3098 = sst [smem:[#allocation28_spill]] %s3071_s3 }
   0x4   :  { %3099 = sst [smem:[#allocation29_spill]] %s3072_s4 }
   0x5   :  { %3100 = sst [smem:[#allocation30_spill]] %s3073_s5 }
   0x6   :  { %3101 = sst [smem:[#allocation31_spill]] %s3074_s6 }
   0x7   :  { %3102 = sst [smem:[#allocation32_spill]] %s3075_s7 }
   0x8   :  { %3103 = sst [smem:[#allocation33_spill]] %s3076_s8 }
   0x9   :  { %3104 = sst [smem:[#allocation34_spill]] %s3077_s9 }
   0xa   :  { %14 = vsyncpa [#allocation3], 0 }
   0xb   :  { %16 = vsyncpa [#allocation3 + $0x1], 0 }
   0xc   :  { %17 = vsyncpa [#allocation6], 0 }
   0xd   :  { %19 = vsyncpa [#allocation6 + $0x1], 0 }
   0xe   :  { %20 = vsyncpa [#allocation4], 0 }
   0xf   :  { %22 = vsyncpa [#allocation4 + $0x1], 0  ;;  %s2323_s30 = smov 0   ;;  %s2325_s10 = smov 0  }
  0x10   :  { %s2327_s11 = smov 0   ;;  %s2329_s12 = smov 0  }
  0x11   :  { %s2331_s13 = smov 0   ;;  %s2333_s14 = smov 0  }
  0x12   :  { %s2335_s15 = smov 0   ;;  %s2337_s16 = smov 0  }
  0x13   :  { %s2339_s17 = smov 0   ;;  %s2341_s18 = smov 0  }
  0x14   :  { %s2343_s19 = smov 0   ;;  %s2345_s20 = smov 0  }
  0x15   :  { %s2347_s21 = smov 0   ;;  %s2349_s22 = smov 0  }
  0x16 LB: > { %3105 = sst [smem:[#allocation13_spill]] %s2234_s14  ;;  %s2394_s23 = sadd.s32 4294967295, %s2266_s22   ;;  %s2266_s22 = sphi %s2349_s22, %s28_s22   ;;  %s2262_s21 = sphi %s2347_s21, %s3156_s21   ;;  %s2258_s20 = sphi %s2345_s20, %s3155_s20   ;;  %s2254_s19 = sphi %s2343_s19, %s3154_s19   ;;  %s2250_s18 = sphi %s2341_s18, %s3153_s18   ;;  %s2246_s17 = sphi %s2339_s17, %s3152_s17   ;;  %s2242_s16 = sphi %s2337_s16, %s3163_s16   ;;  %s2238_s15 = sphi %s2335_s15, %s3162_s15   ;;  %s2234_s14 = sphi %s2333_s14, %s3150_s14   ;;  %s2230_s13 = sphi %s2331_s13, %s3161_s13   ;;  %s2226_s12 = sphi %s2329_s12, %s3160_s12   ;;  %s2222_s11 = sphi %s2327_s11, %s3159_s11   ;;  %s2218_s10 = sphi %s2325_s10, %s3158_s10   ;;  %s2214_s30 = sphi %s2323_s30, %s3157_s30  }
  0x17   : > { %3106 = sst [smem:[#allocation14_spill]] %s2238_s15  ;;  %s37_s24 = sadd.s32 1, %s2258_s20 }
  0x18   : > { %3107 = sst [smem:[#allocation15_spill]] %s2246_s17  ;;  %p38_p0 = scmp.ge.s32.totalorder %s37_s24, 2 }
  0x19   : > { %3108 = sst [smem:[#allocation16_spill]] %s2250_s18  ;;  %s40_s25 = sadd.s32 1, %s2262_s21 }
  0x1a   : > { %3109 = sst [smem:[#allocation17_spill]] %s2254_s19  ;;  %p57_p1 = scmp.eq.s32.totalorder %s2266_s22, 0 }
  0x1b   : > { %3110 = sst [smem:[#allocation18_spill]] %s2258_s20  ;;  %p63_p2 = scmp.eq.s32.totalorder %s2394_s23, 0 }
  0x1c   : > { %3111 = sst [smem:[#allocation19_spill]] %s2262_s21  ;;  %s3165_s24 = smov (%p38_p0, %s37_s24), 0 }
  0x1d   : > { %3112 = sst [smem:[#allocation20_spill]] %s3165_s24  ;;  %s3167_s25 = smov (!%p38_p0, %s40_s25), %s2262_s21 }
  0x1e   : > { %s45_s26 = ssub.s32 %s2258_s20, %s3165_s24  ;;  %s1720_s27 = sshll.u32 %s2258_s20, 3 }
  0x1f   : > { %p42_p3 = scmp.ge.s32.totalorder %s3167_s25, 2  ;;  %s1721_s28 = sadd.s32 4294967295, %s1720_s27 }
  0x20   : > { %p74_p4 = scmp.gt.s32.totalorder %s1721_s28, 0  ;;  %s1722_s29 = sshll.u32 %s3165_s24, 3 }
  0x21   : > { %s3169_s25 = smov (%p42_p3, %s3167_s25), 0  ;;  %s1723_s19 = sadd.s32 4294967295, %s1722_s29 }
  0x22   : > { %3113 = sst [smem:[#allocation21_spill]] %s3169_s25  ;;  %s3171_s28 = smov (!%p74_p4, %s1721_s28), 0 }
  0x23   : > { %s2411_s9 = ssub.s32 %s2262_s21, %s3169_s25  ;;  %p78_p5 = scmp.gt.s32.totalorder %s1723_s19, 0 }
  0x24   : > { %s2414_s8 = sor.u32 %s45_s26, %s2411_s9  ;;  %s85_s6 = sadd.s32 1, %s2234_s14 }
  0x25   : > { %p47_p6 = scmp.eq.s32.totalorder %s2414_s8, 0  ;;  %s3173_s19 = smov (!%p78_p5, %s1723_s19), 0 }
  0x26   : > { %p92_p7 = scmp.ne.s32.totalorder %s2234_s14, %s2230_s13  ;;  %p98_p8 = scmp.ne.s32.totalorder %s2230_s13, %s2226_s12 }
  0x27   : > { %s81_s24 = ssub.s32 %s3171_s28, %s3173_s19  ;;  %s2422_s25 = sadd.s32 8, %s1720_s27 }
  0x28   : > { %s82_s7 = sor.u32 %s81_s24, %s2411_s9  ;;  %p2427_p9 = por %p92_p7, %p57_p1 }
  0x29   : > { %p83_p10 = scmp.eq.s32.totalorder %s82_s7, 0  ;;  %p2433_p11 = por %p98_p8, %p63_p2 }
  0x2a   : > { %s2438_s12 = sadd.s32 8, %s1722_s29  ;;  %p3094_p0 = scmp.lt.s32.totalorder %s2266_s22, 4 }
  0x2b   : > { %s3115_s5 = scalar_select %p2433_p11, 1, 0 }
  0x2c   : > { %s2441_s19 = scalar_select %p83_p10, %s2234_s14, %s85_s6  }
  0x2d   : > { %3116 = sst [smem:[#allocation22_spill]] %s3115_s5  ;;  %s2446_s24 = sshll.u32 %s2262_s21, 5 }
  0x2e   : > { %3117 = sst [smem:[#allocation23_spill]] %s2441_s19  ;;  %s355_s7 = sand.u32 1, %s2266_s22  }
  0x2f   : > { %s357_s27 = sand.u32 1, %s2234_s14   ;;  %s1736_s4 = sshll.u32 %s3171_s28, 1 }
  0x30   : > { %s1733_s18 = sshll.u32 %s357_s27, 3  ;;  %s368_s3 = sadd.s32 %s1736_s4, %s2446_s24 }
  0x31   : > { %s359_s5 = scalar_lea.vmem [#allocation5], %s1733_s18  ;;  %s1738_s6 = sshll.u32 %s368_s3, 2 }
  0x32   : > { %s373_s29 = sshll.u32 %s359_s5, 4  ;;  %s3118_s1 = sld [smem:[#allocation27_spill]]  ;;  %s374_s29 = int_to_ptr.vmem [resolvable:$true] %s373_s29 }
  0x33   : > { %p1890_p3 = pnand %p3094_p0, %p2427_p9  ;;  %p1744_p4 = scmp.ge.s32.totalorder %s2266_s22, 1 }
  0x34   : > { %s2459_s5 = scalar_lea.sflag [#allocation6], %s355_s7  ;;  %s3087_s3 = smov 64  }
  0x35   : > { %s3089_s18 = smov 4   ;;  %p409_p5 = scmp.lt.s32.totalorder %s2266_s22, 5 }
  0x36   : > { %s49_s28 = sadd.s32 1, %s2246_s17  ;;  %p56_p8 = scmp.ne.s32.totalorder %s2246_s17, %s2242_s16 }
  0x37   : > { %p2466_p7 = pnand %p1744_p4, %p409_p5  ;;  %p62_p9 = scmp.ne.s32.totalorder %s2242_s16, %s2238_s15 }
  0x38   : > { %s370_s14 = scalar_lea.hbm %s3118_s1, %s1738_s6  ;;  %p286_p10 = scmp.eq.s32.totalorder %s2394_s23, 3 }
  0x39   : > { %s371_s4 = sshll.u32 %s370_s14, 4  ;;  %s1719_s14 = sadd.s32 4294967294, %s2266_s22   ;;  %s372_s4 = int_to_ptr.hbm [resolvable:$true] %s371_s4 }
  0x3a   : > { %1892 = dma.hbm_to_vmem [thread:$0]  (!%p1890_p3), %s372_s4, 128, %s374_s29, %s2459_s5, %s3087_s3, %s3087_s3, %s3089_s18  }
  0x3b   : > { %s2475_s26 = scalar_select %p47_p6, %s2246_s17, %s49_s28  }
  0x3c   : > { %p292_p13 = scmp.eq.s32.totalorder %s1719_s14, 3  ;;  %p2484_p12 = por %p57_p1, %p56_p8 }
  0x3d   : > { %3120 = sst [smem:[#allocation24_spill]] %s2475_s26  ;;  %p2490_p3 = por %p63_p2, %p62_p9 }
  0x3e   : > { %p2494_p4 = por %p286_p10, %p56_p8  ;;  %p2498_p6 = por %p292_p13, %p62_p9 }
  0x3f   : > { %s330_s29 = sand.u32 1, %s2246_s17   ;;  %s1858_s6 = sshll.u32 %s2258_s20, 4 }
  0x40   : > { %s3124_s27 = scalar_select %p2498_p6, 1, 0 }
  0x41   : > { %s1728_s4 = sshll.u32 %s330_s29, 6  ;;  %s340_s14 = sadd.s32 %s1858_s6, %s2446_s24 }
  0x42   : > { %3125 = sst [smem:[#allocation25_spill]] %s3124_s27  ;;  %s1732_s28 = sshll.u32 %s340_s14, 2 }
  0x43   : > { %s334_s3 = scalar_lea.vmem [#allocation2], %s1728_s4  ;;  %s3126_s0 = sld [smem:[#allocation26_spill]] }
  0x44   : > { %s345_s18 = sshll.u32 %s334_s3, 4  ;;  %p1887_p13 = pnand %p3094_p0, %p2484_p12  ;;  %s346_s18 = int_to_ptr.vmem [resolvable:$true] %s345_s18 }
  0x45   : > { %s331_s6 = scalar_lea.sflag [#allocation3], %s330_s29  ;;  %s3127_s20 = smov 4  }
  0x46   : > { %s3128_s14 = smov 64   ;;  %p3129_p5 = scmp.lt.s32.totalorder %s2422_s25, 15 }
  0x47   : > { %p3130_p8 = scmp.lt.s32.totalorder %s2438_s12, 15  ;;  %s121_s1 = sadd.s32 1, %s2222_s11 }
  0x48   : > { %s3175_s25 = smov (!%p3129_p5, %s2422_s25), 15  ;;  %p128_p9 = scmp.ne.s32.totalorder %s2222_s11, %s2218_s10 }
  0x49   : > { %s342_s27 = scalar_lea.hbm %s3126_s0, %s1732_s28  ;;  %s3177_s12 = smov (!%p3130_p8, %s2438_s12), 15 }
  0x4a   : > { %s343_s17 = sshll.u32 %s342_s27, 4  ;;  %s117_s3 = ssub.s32 %s3175_s25, %s3177_s12  ;;  %s344_s17 = int_to_ptr.hbm [resolvable:$true] %s343_s17 }
  0x4b   : > { %1889 = dma.hbm_to_vmem [thread:$0]  (!%p1887_p13), %s344_s17, 1024, %s346_s18, %s331_s6, %s3128_s14, %s3128_s14, %s3127_s20  }
  0x4c   : > { %p134_p10 = scmp.ne.s32.totalorder %s2218_s10, %s2214_s30  ;;  %s118_s26 = sor.u32 %s117_s3, %s2411_s9 }
  0x4d   : > { %p2529_p12 = por %p128_p9, %p57_p1  ;;  %p119_p0 = scmp.eq.s32.totalorder %s118_s26, 0 }
  0x4e   : > { %p2535_p13 = por %p134_p10, %p63_p2  ;;  %s385_s18 = sand.u32 1, %s2222_s11  }
  0x4f   : > { %s1741_s27 = sshll.u32 %s3175_s25, 1  ;;  %s1739_s30 = sshll.u32 %s385_s18, 3 }
  0x50   : > { %s2541_s29 = scalar_select %p119_p0, %s2222_s11, %s121_s1  }
  0x51   : > { %s396_s9 = sadd.s32 %s1741_s27, %s2446_s24  ;;  %s387_s3 = scalar_lea.vmem [#allocation7], %s1739_s30 }
  0x52   : > { %s1743_s12 = sshll.u32 %s396_s9, 2  ;;  %s401_s0 = sshll.u32 %s387_s3, 4  ;;  %s402_s0 = int_to_ptr.vmem [resolvable:$true] %s401_s0 }
  0x53   : > { %s398_s6 = scalar_lea.hbm %s3070_s2, %s1743_s12  ;;  %p3133_p1 = scmp.lt.s32.totalorder %s2266_s22, 4 }
  0x54   : > { %s399_s15 = sshll.u32 %s398_s6, 4  ;;  %413 = sbr.rel (%p2466_p7) target bundleno = 810 (0x32a), region = 56  ;;  %s400_s15 = int_to_ptr.hbm [resolvable:$true] %s399_s15 }
  0x55   : > { %p1893_p2 = pnand %p3133_p1, %p2529_p12  ;;  %s2558_s25 = sand.u32 (!%p2466_p7), 1, %s2242_s16  }
  0x56   : > { %s1745_s24 = sshll.u32 (!%p2466_p7), %s2558_s25, 6  ;;  %s416_s1 = scalar_lea.sflag (!%p2466_p7), [#allocation3], %s2558_s25 }
  0x57   : > { %1895 = dma.hbm_to_vmem [thread:$0]  (!%p1893_p2), %s400_s15, 128, %s402_s0, %s2459_s5, %s3128_s14, %s3128_s14, %s3127_s20  }
  0x58   : > { %s2562_s26 = scalar_lea.vmem (!%p2466_p7), [#allocation2], %s1745_s24 }
  0x59   : > { %2197 = dma.done.wait (%p2490_p3), %s416_s1, 1024  }
  0x5a   : > { %2199 = vsyncadd (%p2490_p3), %s416_s1, 4294966272  ;;  %s425_s15 = sand.u32 1, %s2394_s23   ;;  %s427_s20 = sand.u32 1, %s2230_s13  }
  0x5b   : > { %s2570_s5 = sshll.u32 %s427_s20, 3  ;;  %s426_s21 = scalar_lea.sflag [#allocation6], %s425_s15 }
  0x5c   : > { %s429_s14 = scalar_lea.vmem [#allocation5], %s2570_s5 }
  0x5d   : > { %2201 = dma.done.wait (%p2433_p11), %s426_s21, 128  }
  0x5e   : > { %2203 = vsyncadd (%p2433_p11), %s426_s21, 4294967168  ;;  %s437_s19 = sand.u32 1, %s2218_s10  }
  0x5f   : > { %s1747_s7 = sshll.u32 %s437_s19, 3 }
  0x60   : > { %s439_s18 = scalar_lea.vmem [#allocation7], %s1747_s7 }
  0x61   : > { %2205 = dma.done.wait (%p2535_p13), %s426_s21, 128  }
  0x62   : > { %2207 = vsyncadd (%p2535_p13), %s426_s21, 4294967168  ;;  %s3135_s30 = sld [smem:[#allocation28_spill]]  ;;  %v1861_v1 = vld [vmem:[%s2562_s26] sm:$0xff]  ;;  %v1864_v2 = vld [vmem:[%s2562_s26 + $0x18] sm:$0xff]  ;;  %vm577_vm0 = vcmask 130048   ;;  %vm859_vm1 = vcmask 1040384  }
  0x63   : > { %v1866_v3 = vld [vmem:[%s2562_s26 + $0x28] sm:$0xff]  ;;  %v1870_v4 = vld [vmem:[%s439_s18] sm:$0xff]  ;;  %v1865_v6 = vld [vmem:[%s2562_s26 + $0x20] sm:$0xff]  ;;  %s3136_s12 = sld [smem:[#allocation29_spill]]  ;;  %vm860_vm2 = vsmask.f32 256 }
  0x64   : > { %v1862_v5 = vld [vmem:[%s2562_s26 + $0x8] sm:$0xff]  ;;  %v1867_v7 = vld [vmem:[%s2562_s26 + $0x30] sm:$0xff]  ;;  %v1868_v10 = vld [vmem:[%s2562_s26 + $0x38] sm:$0xff]  ;;  %s3137_s4 = sld [smem:[#allocation16_spill]]  ;;  %vm878_vm4 = vsmask.f32 7424 }
  0x65   : > { %v1863_v8 = vld [vmem:[%s2562_s26 + $0x10] sm:$0xff]  ;;  %v1869_v9 = vld [vmem:[%s429_s14] sm:$0xff]  ;;  %vm2617_vm3 = vmand %vm859_vm1, %vm860_vm2  ;;  %s2270_s1 = smov 4   ;;  %vm1007_vm5 = vcmask 1046528   ;;  %s2271_s0 = smov 8   ;;  %vm1145_vm6 = vcmask 1045504  }
  0x66   : > { %s3140_s5 = sld [smem:[#allocation30_spill]]  ;;  %vm1048_vm7 = vcmask 31744   ;;  %vm1065_vm8 = vcmask 64512   ;;  %vm1128_vm9 = vcmask 97280   ;;  %vm1443_vm10 = vcmask 1041408   ;;  %s1748_s14 = sshll.u32 %s2558_s25, 7 }
  0x67   : > { %s3143_s21 = sld [smem:[#allocation33_spill]]  ;;  %s2942_s19 = scalar_lea.vmem [#allocation8], %s1748_s14 }
  0x68   : > { %v1871_v0 = vld [vmem:[%s3135_s30] sm:$0xff]  ;;  %s3144_s7 = sld [smem:[#allocation17_spill]] }
  0x69   : > { %609 = vmatpush.bf16.msra.mxu0 %v1871_v0  ;;  %1876 = vmatpush.bf16.msra.mxu1 %v1871_v0  ;;  %v2608_v11 = vld [vmem:[%s3136_s12] ss:$0 sm:$0xff]  ;;  %s3145_s9 = sld [smem:[#allocation34_spill]]  ;;  %s1576_s12 = sshll.u32 %s2942_s19, 4  ;;  %s1577_s12 = int_to_ptr.vmem [resolvable:$true] %s1576_s12 }
  0x6a   : > { %1877 = vmatpush.bf16.msra.mxu3 %v1871_v0  ;;  %706 = vmatpush.bf16.msra.mxu2 %v1871_v0  ;;  %p715_p11 = scmp.ne.s32.totalorder %s3137_s4, 0  ;;  %p721_p0 = scmp.ne.s32.totalorder %s3137_s4, 1 }
  0x6b   : > { %s1875_s18 = sshll.u32 %s3137_s4, 4 }
  0x6c   : > { %1785 = vmatmul.msk.bf16.vlgmr.msra.gmra.mxu0 %vm577_vm0, %v1861_v1  ;;  %1788 = vmatmul.msk.bf16.vlgmr.msra.gmra.mxu1 %vm577_vm0, %v1864_v2  ;;  %s2636_s28 = scalar_select %p715_p11, 1, 0 }
  0x6d   : > { %682 = vmatpush.bf16.msrb.mxu1 %v1871_v0  ;;  %1790 = vmatmul.msk.bf16.vlgmr.msra.gmra.mxu3 %vm577_vm0, %v1866_v3  ;;  %s2642_s6 = scalar_select %p721_p0, 1, 0 }
  0x6e   : > { %1802 = vmatmul.msk.bf16.vlgmr.msra.gmra.mxu2 %vm577_vm0, %v1870_v4  ;;  %s717_s3 = scvt.s32.f32 %s2636_s28  ;;  %s1850_s23 = sshll.u32 %s3144_s7, 5 }
  0x6f   : > { %s723_s24 = scvt.s32.f32 %s2642_s6  ;;  %s3141_s6 = sld [smem:[#allocation32_spill]] }
  0x70   : > { %s1573_s27 = sadd.s32 %s1875_s18, %s1850_s23  ;;  %s2132_s20 = scalar_lea.hbm %s3145_s9, 512 }
  0x71   : > { %s1851_s30 = sshll.u32 %s1573_s27, 3 }
  0x72   : > { %s1575_s4 = scalar_lea.hbm %s3145_s9, %s1851_s30 }
  0x73   : > { %s1578_s28 = sshll.u32 %s1575_s4, 4  ;;  %s1579_s28 = int_to_ptr.hbm [resolvable:$true] %s1578_s28 }
  0x7c   : > { %1786 = vmatmul.msk.bf16.gmra.mxu0 %vm577_vm0, %v1862_v5  ;;  %1789 = vmatmul.msk.bf16.gmra.mxu1 %vm577_vm0, %v1865_v6 }
  0x7d   : > { %1791 = vmatmul.msk.bf16.gmra.mxu3 %vm577_vm0, %v1867_v7 }
  0x8c   : > { %1787 = vmatmul.msk.bf16.gmra.mxu0 %vm577_vm0, %v1863_v8  ;;  %1797 = vmatmul.msk.bf16.vlgmr.msrb.gmra.mxu1 %vm577_vm0, %v1869_v9 }
  0x8d   : > { %1792 = vmatmul.msk.bf16.gmra.mxu3 %vm577_vm0, %v1868_v10 }
  0xe9   : > { %v611_v12 = vpop.f32.mrf.mxu0  ;;  %v626_v13 = vpop.f32.mrf.mxu1 }
  0xea   : > { %v612_v14 = vadd.f32 %v2608_v11, %v611_v12  ;;  %v627_v22 = vadd.f32 %v2608_v11, %v626_v13 }
  0xec   : > { %v651_v15 = vmax.f32 %v612_v14, 0.0  ;;  %v657_v30 = vmax.f32 %v627_v22, 0.0 }
  0xee   : > { %v729_v20 = vpack.c.bf16 %v651_v15, %v651_v15  ;;  %v735_v39 = vpack.c.bf16 %v657_v30, %v657_v30  ;;  %v724_v30 = vstv %s723_s24 }
  0xf0   : > { %v636_v16 = vpop.f32.mrf.mxu3  ;;  %v765_v25 = vunpack.c.l.b16 %v729_v20  ;;  %v771_v52 = vunpack.c.l.b16 %v735_v39 }
  0xf1   : > { %v613_v17 = vpop.f32.mrf.mxu0  ;;  %v628_v18 = vpop.f32.mrf.mxu1  ;;  %v637_v33 = vadd.f32 %v2608_v11, %v636_v16 }
  0xf2   : > { %v614_v19 = vadd.f32 %v2608_v11, %v613_v17  ;;  %v629_v24 = vadd.f32 %v2608_v11, %v628_v18  ;;  %v708_v60 = vpop.f32.mrf.mxu2 }
  0xf3   : > { %v661_v43 = vmax.f32 %v637_v33, 0.0  ;;  %v709_v9 = vadd.f32 %v2608_v11, %v708_v60 }
  0xf4   : > { %v652_v21 = vmax.f32 %v614_v19, 0.0  ;;  %v658_v32 = vmax.f32 %v629_v24, 0.0 }
  0xf5   : > { %v739_v57 = vpack.c.bf16 %v661_v43, %v661_v43 }
  0xf6   : > { %v730_v23 = vpack.c.bf16 %v652_v21, %v652_v21  ;;  %v736_v42 = vpack.c.bf16 %v658_v32, %v658_v32 }
  0xf7   : > { %v775_v13 = vunpack.c.l.b16 %v739_v57 }
  0xf8   : > { %v766_v26 = vunpack.c.l.b16 %v730_v23  ;;  %v638_v27 = vpop.f32.mrf.mxu3  ;;  %v772_v56 = vunpack.c.l.b16 %v736_v42 }
  0xf9   : > { %v616_v28 = vpop.f32.mrf.mxu0  ;;  %v631_v29 = vpop.f32.mrf.mxu1  ;;  %v639_v36 = vadd.f32 %v2608_v11, %v638_v27 }
  0xfa   : > { %v780_v31 = vpack.c.b16 %v766_v26, %v765_v25  ;;  %v617_v35 = vadd.f32 %v2608_v11, %v616_v28  ;;  %v632_v38 = vadd.f32 %v2608_v11, %v631_v29  ;;  %v2645_v6 = vpack.c.b16 %v772_v56, %v771_v52 }
  0xfb   : > { %v662_v46 = vmax.f32 %v639_v36, 0.0  ;;  %v718_v25 = vstv %s717_s3  ;;  %v713_v26 = vmax.f32 %v709_v9, 0.0  ;;  %s2126_s3 = sshra.s32 %s1579_s28, 4  ;;  %s2127_s3 = int_to_ptr.hbm [resolvable:$true] %s2126_s3 }
  0xfc   : > { %v795_v34 = vshrl.u32 %v780_v31, 16  ;;  %v798_v41 = vshll.u32 %v780_v31, 16  ;;  %v653_v45 = vmax.f32 %v617_v35, 0.0  ;;  %v659_v49 = vmax.f32 %v632_v38, 0.0  ;;  %v710_v31 = vpop.f32.mrf.mxu2  ;;  %s2128_s24 = scalar_lea.hbm %s2127_s3, 128  ;;  %p2133_p8 = scmp.lt.s32.totalorder %s2127_s3, %s3145_s9 }
  0xfd   : > { %v740_v0 = vpack.c.bf16 %v662_v46, %v662_v46  ;;  %v816_v24 = vshrl.u32 %v2645_v6, 16  ;;  %v819_v36 = vshll.u32 %v2645_v6, 16  ;;  %p2129_p7 = scmp.ne.s32.totalorder %s2127_s3, %s2128_s24  ;;  %p2134_p9 = scmp.lt.s32.totalorder %s2132_s20, %s2128_s24 }
  0xfe   : > { %v797_v40 = vrot.slane %v795_v34, 7  ;;  %v731_v61 = vpack.c.bf16 %v653_v45, %v653_v45  ;;  %v737_v1 = vpack.c.bf16 %v659_v49, %v659_v49 }
  0xff   : > { %v776_v14 = vunpack.c.l.b16 %v740_v0  ;;  %v2667_v45 = vrot.slane %v816_v24, 7  ;;  %p2130_p3 = pnand %p2129_p7, %p2494_p4  ;;  %p2135_p10 = por %p2134_p9, %p2133_p8 }
 0x100   : > { %v800_v44 = vor.u32 %v798_v41, %v797_v40  ;;  %v2625_v47 = vsel %vm2617_vm3, %v797_v40, 0  ;;  %v641_v48 = vpop.f32.mrf.mxu3  ;;  %v767_v10 = vunpack.c.l.b16 %v731_v61  ;;  %v773_v16 = vunpack.c.l.b16 %v737_v1 }
 0x101   : > { %v618_v50 = vpop.f32.mrf.mxu0  ;;  %v633_v51 = vpop.f32.mrf.mxu1  ;;  %v899_v59 = vshll.u32 %v2625_v47, 16  ;;  %v2655_v28 = vpack.c.b16 %v776_v14, %v775_v13  ;;  %v2658_v29 = vadd.f32 %v2608_v11, %v641_v48  ;;  %v711_v40 = vadd.f32 %v2608_v11, %v710_v31  ;;  %p2131_p5 = pneg %p2130_p3 }
 0x102   : > { %v2630_v53 = vsel %vm2617_vm3, 0, %v800_v44  ;;  %v619_v54 = vadd.f32 %v2608_v11, %v618_v50  ;;  %v634_v55 = vadd.f32 %v2608_v11, %v633_v51  ;;  %v1012_v42 = vrot.slane %v2625_v47, 1 }
 0x103   : > { %v894_v58 = vshll.u32 %v2630_v53, 16  ;;  %v892_v2 = vshrl.u32 %v2630_v53, 16  ;;  %v901_v8 = vrot.slane %v899_v59, 1  ;;  %v1011_v35 = vrot.slane %v2630_v53, 1  ;;  %p2136_p12 = pnand %p2135_p10, %p2131_p5 }
 0x104   : > { %v654_v62 = vmax.f32 %v619_v54, 0.0  ;;  %v660_v63 = vmax.f32 %v634_v55, 0.0  ;;  %v725_v44 = vmul.f32 %v724_v30, %v713_v26  ;;  %v830_v48 = vshrl.u32 %v2655_v28, 16 }
 0x105   : > { %v896_v3 = vrot.slane %v894_v58, 1  ;;  %v663_v55 = vmax.f32 %v2658_v29, 0.0  ;;  %v1013_v56 = vsel %vm1007_vm5, %v1011_v35, %v1012_v42  ;;  %v714_v60 = vmax.f32 %v711_v40, 0.0 }
 0x106   : > { %v732_v4 = vpack.c.bf16 %v654_v62, %v654_v62  ;;  %v738_v5 = vpack.c.bf16 %v660_v63, %v660_v63  ;;  %v745_v0 = vpack.c.bf16 %v725_v44, %v725_v44  ;;  %v833_v24 = vshll.u32 %v2655_v28, 16 }
 0x107   : > { %v897_v7 = vor.u32 %v896_v3, %v892_v2  ;;  %v726_v13 = vmul.f32 %v724_v30, %v714_v60 }
 0x108   : > { %v768_v12 = vunpack.c.l.b16 %v732_v4  ;;  %v643_v15 = vpop.f32.mrf.mxu3  ;;  %v774_v17 = vunpack.c.l.b16 %v738_v5 }
 0x109   : > { %v621_v18 = vpop.f32.mrf.mxu0  ;;  %v684_v19 = vpop.f32.mrf.mxu1  ;;  %v902_v20 = vsel %vm878_vm4, %v897_v7, %v901_v8  ;;  %v644_v43 = vadd.f32 %v2608_v11, %v643_v15 }
 0x10a   : > { %v781_v21 = vpack.c.b16 %v768_v12, %v767_v10  ;;  %v622_v22 = vadd.f32 %v2608_v11, %v621_v18  ;;  %v685_v23 = vadd.f32 %v2608_v11, %v684_v19  ;;  %977 = vrot.lane.b32.xlu0 %v902_v20, %s2270_s1  ;;  %v2660_v32 = vpack.c.b16 %v774_v17, %v773_v16 }
 0x10b   : > { %v664_v62 = vmax.f32 %v644_v43, 0.0  ;;  %v1259_v17 = vunpack.c.l.b16 %v745_v0 }
 0x10c   : > { %v802_v27 = vshrl.u32 %v781_v21, 16  ;;  %v655_v33 = vmax.f32 %v622_v22, 0.0  ;;  %v689_v34 = vmax.f32 %v685_v23, 0.0  ;;  %v805_v39 = vshll.u32 %v781_v21, 16 }
 0x10d   : > { %v823_v51 = vshrl.u32 %v2660_v32, 16  ;;  %v826_v1 = vshll.u32 %v2660_v32, 16  ;;  %v746_v22 = vpack.c.bf16 %v726_v13, %v726_v13  ;;  %v821_v23 = vor.u32 %v819_v36, %v2667_v45 }
 0x10e   : > { %v804_v38 = vrot.slane %v802_v27, 7  ;;  %v719_v41 = vmul.f32 %v718_v25, %v689_v34  ;;  %v733_v52 = vpack.c.bf16 %v655_v33, %v655_v33  ;;  %v2695_v32 = vrot.slane %v830_v48, 7 }
 0x10f   : > { %v2687_v5 = vrot.slane %v823_v51, 7  ;;  %v1260_v31 = vunpack.c.l.b16 %v746_v22  ;;  %v741_v33 = vpack.c.bf16 %v663_v55, %v663_v55  ;;  %v742_v34 = vpack.c.bf16 %v664_v62, %v664_v62 }
 0x110   : > { %v807_v46 = vor.u32 %v805_v39, %v804_v38  ;;  %v2672_v49 = vsel %vm2617_vm3, %v804_v38, 0  ;;  %v646_v50 = vpop.f32.mrf.mxu3  ;;  %v727_v61 = vpack.c.bf16 %v719_v41, %v719_v41  ;;  %v769_v6 = vunpack.c.l.b16 %v733_v52 }
 0x111   : > { %v623_v54 = vpop.f32.mrf.mxu0  ;;  %v686_v47 = vpop.f32.mrf.mxu1  ;;  %v911_v63 = vshll.u32 %v2672_v49, 16  ;;  %v647_v8 = vadd.f32 %v2608_v11, %v646_v50  ;;  %v828_v38 = vor.u32 %v826_v1, %v2687_v5  ;;  %v1261_v28 = vpack.c.b16 %v1260_v31, %v1259_v17 }
 0x112   : > { %v2679_v57 = vsel %vm2617_vm3, 0, %v807_v46  ;;  %v624_v58 = vadd.f32 %v2608_v11, %v623_v54  ;;  %v687_v59 = vadd.f32 %v2608_v11, %v686_v47  ;;  %1034 = vrot.lane.b32.xlu0 %v1013_v56, %s2271_s0  ;;  %v763_v14 = vunpack.c.l.b16 %v727_v61 }
 0x113   : > { %v906_v4 = vshll.u32 %v2679_v57, 16  ;;  %v904_v7 = vshrl.u32 %v2679_v57, 16  ;;  %v913_v15 = vrot.slane %v911_v63, 1  ;;  %v665_v16 = vmax.f32 %v647_v8, 0.0 }
 0x114   : > { %v656_v2 = vmax.f32 %v624_v58, 0.0  ;;  %v690_v3 = vmax.f32 %v687_v59, 0.0  ;;  %v1263_v48 = vshrl.u32 %v1261_v28, 16  ;;  %v777_v50 = vunpack.c.l.b16 %v741_v33 }
 0x115   : > { %v908_v12 = vrot.slane %v906_v4, 1  ;;  %v743_v26 = vpack.c.bf16 %v665_v16, %v665_v16  ;;  %v1015_v51 = vrot.slane %v2672_v49, 1  ;;  %v1266_v54 = vshll.u32 %v1261_v28, 16 }
 0x116   : > { %v734_v9 = vpack.c.bf16 %v656_v2, %v656_v2  ;;  %v720_v10 = vmul.f32 %v718_v25, %v690_v3  ;;  %v778_v47 = vunpack.c.l.b16 %v742_v34  ;;  %v1265_v58 = vrot.slane %v1263_v48, 7 }
 0x117   : > { %v909_v20 = vor.u32 %v908_v12, %v904_v7  ;;  %v1084_v41 = vunpack.c.l.b16 %v743_v26  ;;  %v2703_v59 = vsel %vm2617_vm3, 0, %v828_v38  ;;  %v2718_v2 = vsel %vm2617_vm3, 0, %v821_v23 }
 0x118   : > { %v770_v18 = vunpack.c.l.b16 %v734_v9  ;;  %v728_v19 = vpack.c.bf16 %v720_v10, %v720_v10  ;;  %v648_v21 = vpop.f32.mrf.mxu3  ;;  %v1268_v1 = vor.u32 %v1266_v54, %v1265_v58  ;;  %v835_v3 = vor.u32 %v833_v24, %v2695_v32 }
 0x119   : > { %v649_v27 = vadd.f32 %v2608_v11, %v648_v21  ;;  %v914_v30 = vsel %vm878_vm4, %v909_v20, %v913_v15  ;;  %v1014_v11 = vrot.slane %v2679_v57, 1  ;;  %v2725_v4 = vsel %vm2617_vm3, %v2667_v45, 0 }
 0x11a   : > { %v782_v29 = vpack.c.b16 %v770_v18, %v769_v6  ;;  %v764_v25 = vunpack.c.l.b16 %v728_v19  ;;  %979 = vrot.lane.b32.xlu1 %v914_v30, %s2270_s1  ;;  %v786_v6 = vpack.c.b16 %v778_v47, %v777_v50  ;;  %v2739_v17 = vsel %vm2617_vm3, 0, %v1268_v1 }
 0x11b   : > { %v666_v35 = vmax.f32 %v649_v27, 0.0  ;;  %v1016_v60 = vsel %vm1007_vm5, %v1014_v11, %v1015_v51  ;;  %v2743_v18 = vsel %vm2617_vm3, 0, %v835_v3  ;;  %v2749_v21 = vsel %vm2617_vm3, %v2687_v5, 0 }
 0x11c   : > { %v809_v36 = vshrl.u32 %v782_v29, 16  ;;  %v779_v39 = vpack.c.b16 %v764_v25, %v763_v14  ;;  %v812_v40 = vshll.u32 %v782_v29, 16  ;;  %v942_v14 = vshll.u32 %v2703_v59, 16 }
 0x11d   : > { %v744_v42 = vpack.c.bf16 %v666_v35, %v666_v35  ;;  %v837_v22 = vshrl.u32 %v786_v6, 16  ;;  %v947_v35 = vshll.u32 %v2749_v21, 16  ;;  %v940_v38 = vshrl.u32 %v2703_v59, 16 }
 0x11e   : > { %v811_v43 = vrot.slane %v809_v36, 7  ;;  %v788_v44 = vshrl.u32 %v779_v39, 16  ;;  %v791_v46 = vshll.u32 %v779_v39, 16  ;;  %v944_v34 = vrot.slane %v942_v14, 1  ;;  %v1805_v14 = vld [vmem:[%s3140_s5 + $0x8] sm:$0xf] }
 0x11f   : > { %v1085_v52 = vunpack.c.l.b16 %v744_v42  ;;  %v1020_v36 = vrot.slane %v2718_v2, 1  ;;  %v876_v39 = vsel %vm2617_vm3, %v2695_v32, 0  ;;  %v954_v28 = vshll.u32 %v2743_v18, 16 }
 0x120   : > { %v814_v55 = vor.u32 %v812_v40, %v811_v43  ;;  %v790_v56 = vrot.slane %v788_v44, 7  ;;  %v873_v62 = vsel %vm2617_vm3, %v811_v43, 0  ;;  %v839_v40 = vrot.slane %v837_v22, 7 }
 0x121   : > { %v1086_v61 = vpack.c.b16 %v1085_v52, %v1084_v41  ;;  %v923_v8 = vshll.u32 %v873_v62, 16  ;;  %v1018_v23 = vrot.slane %v873_v62, 1  ;;  %v840_v41 = vshll.u32 %v786_v6, 16 }
 0x122   : > { %v2710_v63 = vsel %vm2617_vm3, 0, %v814_v55  ;;  %v793_v49 = vor.u32 %v791_v46, %v790_v56  ;;  %v2714_v0 = vsel %vm2617_vm3, %v790_v56, 0  ;;  %1036 = vrot.lane.b32.xlu1 %v1016_v60, %s2271_s0  ;;  %v1021_v42 = vrot.slane %v2725_v4, 1 }
 0x123   : > { %v918_v7 = vshll.u32 %v2710_v63, 16  ;;  %v1088_v10 = vshrl.u32 %v1086_v61, 16  ;;  %v887_v13 = vshll.u32 %v2714_v0, 16  ;;  %v1017_v15 = vrot.slane %v2710_v63, 1 }
 0x124   : > { %v2730_v9 = vsel %vm2617_vm3, 0, %v793_v49  ;;  %v916_v45 = vshrl.u32 %v2710_v63, 16  ;;  %v925_v26 = vrot.slane %v923_v8, 1  ;;  %v1091_v29 = vshll.u32 %v1086_v61, 16 }
 0x125   : > { %v882_v12 = vshll.u32 %v2730_v9, 16  ;;  %v920_v16 = vrot.slane %v918_v7, 1  ;;  %v880_v19 = vshrl.u32 %v2730_v9, 16  ;;  %v1090_v27 = vrot.slane %v1088_v10, 7 }
 0x126   : > { %v889_v30 = vrot.slane %v887_v13, 1  ;;  %v1019_v31 = vsel %vm1007_vm5, %v1017_v15, %v1018_v23  ;;  %v945_v43 = vor.u32 %v944_v34, %v940_v38  ;;  %v949_v44 = vrot.slane %v947_v35, 1  ;;  %v1873_v15 = vld [vmem:[%s3140_s5 + $0x8] sm:$0x30] }
 0x127   : > { %v884_v20 = vrot.slane %v882_v12, 1  ;;  %v921_v24 = vor.u32 %v920_v16, %v916_v45  ;;  %v1093_v11 = vor.u32 %v1091_v29, %v1090_v27  ;;  %v1008_v46 = vrot.slane %v2730_v9, 1 }
 0x128   : > { %v1009_v48 = vrot.slane %v2714_v0, 1  ;;  %v959_v50 = vshll.u32 %v876_v39, 16  ;;  %v930_v51 = vshll.u32 %v2718_v2, 16  ;;  %v2770_v52 = vsel %vm2617_vm3, %v1265_v58, 0 }
 0x129   : > { %v885_v25 = vor.u32 %v884_v20, %v880_v19  ;;  %v926_v33 = vsel %vm878_vm4, %v921_v24, %v925_v26  ;;  %v952_v32 = vshrl.u32 %v2743_v18, 16  ;;  %v956_v54 = vrot.slane %v954_v28, 1 }
 0x12a   : > { %1038 = vrot.lane.b32.xlu1 %v1019_v31, %s2271_s0  ;;  %981 = vrot.lane.b32.xlu0 %v926_v33, %s2270_s1  ;;  %v1274_v55 = vshrl.u32 %v2739_v17, 16  ;;  %v1276_v47 = vshll.u32 %v2739_v17, 16  ;;  %v842_v56 = vor.u32 %v840_v41, %v839_v40  ;;  %v2777_v60 = vsel %vm2617_vm3, 0, %v1093_v11 }
 0x12b   : > { %v890_v5 = vsel %vm878_vm4, %v885_v25, %v889_v30  ;;  %v1022_v61 = vsel %vm1007_vm5, %v1020_v36, %v1021_v42  ;;  %v1281_v62 = vshll.u32 %v2770_v52, 16  ;;  %v950_v49 = vsel %vm878_vm4, %v945_v43, %v949_v44 }
 0x12c   : > { %975 = vrot.lane.b32.xlu2 %v890_v5, %s2270_s1  ;;  %v1026_v58 = vrot.slane %v2743_v18, 1  ;;  %v1027_v0 = vrot.slane %v876_v39, 1  ;;  %v1278_v1 = vrot.slane %v1276_v47, 1  ;;  %v1010_v3 = vsel %vm1007_vm5, %v1008_v46, %v1009_v48 }
 0x12d   : > { %v961_v6 = vrot.slane %v959_v50, 1  ;;  %v932_v7 = vrot.slane %v930_v51, 1  ;;  %v1283_v8 = vrot.slane %v1281_v62, 1  ;;  %v957_v10 = vor.u32 %v956_v54, %v952_v32  ;;  %v1817_v62 = vld [vmem:[%s3140_s5] sm:$0xf] }
 0x12e   : > { %v1101_v12 = vshll.u32 %v2777_v60, 16  ;;  %v1279_v13 = vor.u32 %v1278_v1, %v1274_v55  ;;  %v928_v45 = vshrl.u32 %v2718_v2, 16  ;;  %v935_v16 = vshll.u32 %v2725_v4, 16 }
 0x12f   : > { %v1097_v19 = vsel %vm2617_vm3, %v1090_v27, 0  ;;  %v1806_v20 = vor.u32 %v1873_v15, %v1805_v14  ;;  %v1028_v23 = vsel %vm1007_vm5, %v1026_v58, %v1027_v0  ;;  %v962_v29 = vsel %vm878_vm4, %v957_v10, %v961_v6 }
 0x130   : > { %v1284_v22 = vsel %vm878_vm4, %v1279_v13, %v1283_v8  ;;  %v933_v24 = vor.u32 %v932_v7, %v928_v45  ;;  %v1099_v25 = vshrl.u32 %v2777_v60, 16  ;;  %v1103_v30 = vrot.slane %v1101_v12, 1 }
 0x131   : > { %v1147_v26 = vsel %vm1145_vm6, %v1806_v20, 0  ;;  %v1106_v31 = vshll.u32 %v1097_v19, 16  ;;  %v2805_v4 = vsel %vm2617_vm3, 0, %v842_v56  ;;  %v937_v27 = vrot.slane %v935_v16, 1  ;;  %v1874_v56 = vld [vmem:[%s3140_s5 + $0x10] sm:$0x30] }
 0x132   : > { %985 = vrot.lane.b32.xlu1 %v950_v49, %s2270_s1  ;;  %1040 = vrot.lane.b32.xlu0 %v1022_v61, %s2271_s0  ;;  %v877_v33 = vsel %vm2617_vm3, %v839_v40, 0  ;;  %v1104_v35 = vor.u32 %v1103_v30, %v1099_v25  ;;  %v1029_v38 = vrot.slane %v2805_v4, 1  ;;  %v966_v39 = vshll.u32 %v2805_v4, 16  ;;  %v1872_v49 = vld [vmem:[%s3140_s5] sm:$0x30] }
 0x133   : > { %1156 = vmatpush.bf16.msrb.mxu3 %v1147_v26  ;;  %v938_v34 = vsel %vm878_vm4, %v933_v24, %v937_v27  ;;  %v1108_v5 = vrot.slane %v1106_v31, 1  ;;  %v1030_v36 = vrot.slane %v877_v33, 1  ;;  %v1023_v28 = vrot.slane %v2703_v59, 1 }
 0x134   : > { %1032 = vrot.lane.b32.xlu2 %v1010_v3, %s2271_s0  ;;  %v1024_v37 = vrot.slane %v2749_v21, 1  ;;  %v964_v11 = vshrl.u32 %v2805_v4, 16  ;;  %v968_v42 = vrot.slane %v966_v39, 1  ;;  %v971_v43 = vshll.u32 %v877_v33, 16 }
 0x135   : > { %v1109_v40 = vsel %vm878_vm4, %v1104_v35, %v1108_v5  ;;  %v1031_v41 = vsel %vm1007_vm5, %v1029_v38, %v1030_v36  ;;  %v1289_v46 = vrot.slane %v2739_v17, 1  ;;  %v1290_v21 = vrot.slane %v2770_v52, 1  ;;  %v1829_v52 = vld [vmem:[%s3140_s5 + $0x10] sm:$0xf] }
 0x136   : > { %v1025_v44 = vsel %vm1007_vm5, %v1023_v28, %v1024_v37  ;;  %v969_v48 = vor.u32 %v968_v42, %v964_v11  ;;  %v973_v50 = vrot.slane %v971_v43, 1  ;;  %v1114_v54 = vrot.slane %v2777_v60, 1 }
 0x137   : > { %v1291_v51 = vsel %vm1007_vm5, %v1289_v46, %v1290_v21  ;;  %v1115_v55 = vrot.slane %v1097_v19, 1  ;;  %v1830_v61 = vor.u32 %v1874_v56, %v1829_v52  ;;  %v1818_v0 = vor.u32 %v1872_v49, %v1817_v62 }
 0x138   : > { %v974_v32 = vsel %vm878_vm4, %v969_v48, %v973_v50 }
 0x139   : > { %v1116_v47 = vsel %vm1007_vm5, %v1114_v54, %v1115_v55  ;;  %v1306_v58 = vsel %vm1145_vm6, %v1830_v61, 0  ;;  %v1206_v1 = vsel %vm1145_vm6, %v1818_v0, 0 }
 0x13a   : > { %1044 = vrot.lane.b32.xlu1 %v1028_v23, %s2271_s0  ;;  %987 = vrot.lane.b32.xlu0 %v962_v29, %s2270_s1 }
 0x13b   : > { %1315 = vmatpush.bf16.msrb.mxu2 %v1306_v58  ;;  %1215 = vmatpush.bf16.msra.mxu1 %v1206_v1 }
 0x13c   : > { %983 = vrot.lane.b32.xlu2 %v938_v34, %s2270_s1 }
 0x142   : > { %1110 = vrot.lane.b32.xlu1 %v1109_v40, %s2270_s1  ;;  %1046 = vrot.lane.b32.xlu0 %v1031_v41, %s2271_s0 }
 0x144   : > { %1042 = vrot.lane.b32.xlu2 %v1025_v44, %s2271_s0 }
 0x14a   : > { %1285 = vrot.lane.b32.xlu0 %v1284_v22, %s2270_s1  ;;  %1292 = vrot.lane.b32.xlu1 %v1291_v51, %s2271_s0 }
 0x14c   : > { %989 = vrot.lane.b32.xlu2 %v974_v32, %s2270_s1  ;;  %s3142_s1 = sld [smem:[#allocation31_spill]] }
 0x152   : > { %v2908_v32 = vld [vmem:[%s3142_s1] ss:$0 sm:$0xff] }
 0x154   : > { %1117 = vrot.lane.b32.xlu2 %v1116_v47, %s2271_s0 }
 0x17c   : > { %v978_v3 = vpop.permute.xlu0 %977 }
 0x17d   : > { %v1052_v6 = vsel %vm1048_vm7, %v2630_v53, %v978_v3 }
 0x184   : > { %v1035_v7 = vpop.permute.xlu0 %1034 }
 0x185   : > { %v1069_v8 = vsel %vm1065_vm8, %v1052_v6, %v1035_v7 }
 0x186   : > { %v976_v10 = vpop.permute.xlu2 %975  ;;  %1807 = vmatmul.msk.bf16.vlgmr.msrb.gmra.mxu3 %vm1128_vm9, %v1069_v8 }
 0x187   : > { %v1050_v13 = vsel %vm1048_vm7, %v2730_v9, %v976_v10 }
 0x18c   : > { %v980_v12 = vpop.permute.xlu1 %979 }
 0x18d   : > { %v1054_v45 = vsel %vm1048_vm7, %v2679_v57, %v980_v12 }
 0x18e   : > { %v1033_v14 = vpop.permute.xlu2 %1032 }
 0x18f   : > { %v1067_v15 = vsel %vm1065_vm8, %v1050_v13, %v1033_v14 }
 0x190   : > { %1819 = vmatmul.msk.bf16.vlgmr.msra.gmra.mxu1 %vm1128_vm9, %v1067_v15 }
 0x194   : > { %v1037_v16 = vpop.permute.xlu1 %1036 }
 0x195   : > { %v1071_v53 = vsel %vm1065_vm8, %v1054_v45, %v1037_v16 }
 0x196   : > { %1808 = vmatmul.msk.bf16.gmra.mxu3 %vm1128_vm9, %v1071_v53  ;;  %1831 = vmatmul.msk.bf16.vlgmr.msrb.gmra.mxu2 %vm1128_vm9, %v1071_v53  ;;  %v984_v57 = vpop.permute.xlu2 %983 }
 0x197   : > { %v1058_v24 = vsel %vm1048_vm7, %v2718_v2, %v984_v57 }
 0x19c   : > { %v982_v19 = vpop.permute.xlu0 %981  ;;  %v1039_v20 = vpop.permute.xlu1 %1038 }
 0x19d   : > { %v1056_v9 = vsel %vm1048_vm7, %v2710_v63, %v982_v19 }
 0x19e   : > { %v1073_v22 = vsel %vm1065_vm8, %v1056_v9, %v1039_v20  ;;  %v1043_v25 = vpop.permute.xlu2 %1042 }
 0x1a0   : > { %1820 = vmatmul.msk.bf16.gmra.mxu1 %vm1128_vm9, %v1069_v8 }
 0x1a4   : > { %v1041_v23 = vpop.permute.xlu0 %1040  ;;  %v986_v63 = vpop.permute.xlu1 %985 }
 0x1a5   : > { %v1075_v26 = vsel %vm1065_vm8, %v1058_v24, %v1041_v23  ;;  %v1060_v29 = vsel %vm1048_vm7, %v2703_v59, %v986_v63  ;;  %v526_v59 = vld [vmem:[%s3141_s6] sm:$0x3]  ;;  %s1561_s6 = scalar_lea.sflag [#allocation4], %s2558_s25 }
 0x1a6   : > { %1809 = vmatmul.msk.bf16.gmra.mxu3 %vm1128_vm9, %v1073_v22  ;;  %1832 = vmatmul.msk.bf16.gmra.mxu2 %vm1128_vm9, %v1073_v22  ;;  %v1077_v30 = vsel %vm1065_vm8, %v1060_v29, %v1043_v25  ;;  %v1445_v34 = vsel %vm1443_vm10, %v526_v59, 0  ;;  %v990_v35 = vpop.permute.xlu2 %989 }
 0x1a7   : > { %1454 = vmatpush.bf16.msrb.mxu0 %v1445_v34 }
 0x1ac   : > { %v988_v2 = vpop.permute.xlu0 %987  ;;  %v1045_v31 = vpop.permute.xlu1 %1044 }
 0x1ad   : > { %v1062_v27 = vsel %vm1048_vm7, %v2743_v18, %v988_v2  ;;  %v1064_v18 = vsel %vm1048_vm7, %v2805_v4, %v990_v35 }
 0x1ae   : > { %v1079_v33 = vsel %vm1065_vm8, %v1062_v27, %v1045_v31  ;;  %v1118_v28 = vpop.permute.xlu2 %1117 }
 0x1b0   : > { %1821 = vmatmul.msk.bf16.gmra.mxu1 %vm1128_vm9, %v1071_v53 }
 0x1b4   : > { %v1047_v5 = vpop.permute.xlu0 %1046  ;;  %v1111_v36 = vpop.permute.xlu1 %1110 }
 0x1b5   : > { %v1081_v38 = vsel %vm1065_vm8, %v1064_v18, %v1047_v5  ;;  %v1120_v39 = vsel %vm1048_vm7, %v2777_v60, %v1111_v36 }
 0x1b6   : > { %1810 = vmatmul.msk.bf16.gmra.mxu3 %vm1128_vm9, %v1075_v26  ;;  %1833 = vmatmul.msk.bf16.gmra.mxu2 %vm1128_vm9, %v1075_v26  ;;  %v1122_v37 = vsel %vm1065_vm8, %v1120_v39, %v1118_v28 }
 0x1bc   : > { %v1286_v4 = vpop.permute.xlu0 %1285  ;;  %v1293_v41 = vpop.permute.xlu1 %1292 }
 0x1bd   : > { %v1295_v40 = vsel %vm1048_vm7, %v2739_v17, %v1286_v4 }
 0x1be   : > { %v1297_v11 = vsel %vm1065_vm8, %v1295_v40, %v1293_v41 }
 0x1c0   : > { %1822 = vmatmul.msk.bf16.gmra.mxu1 %vm1128_vm9, %v1073_v22 }
 0x1c6   : > { %1811 = vmatmul.msk.bf16.gmra.mxu3 %vm1128_vm9, %v1077_v30  ;;  %1834 = vmatmul.msk.bf16.gmra.mxu2 %vm1128_vm9, %v1077_v30 }
 0x1d0   : > { %1823 = vmatmul.msk.bf16.gmra.mxu1 %vm1128_vm9, %v1075_v26 }
 0x1d6   : > { %1812 = vmatmul.msk.bf16.gmra.mxu3 %vm1128_vm9, %v1079_v33  ;;  %1835 = vmatmul.msk.bf16.gmra.mxu2 %vm1128_vm9, %v1079_v33 }
 0x1e0   : > { %1824 = vmatmul.msk.bf16.gmra.mxu1 %vm1128_vm9, %v1077_v30 }
 0x1e6   : > { %1813 = vmatmul.msk.bf16.gmra.mxu3 %vm1128_vm9, %v1081_v38  ;;  %1836 = vmatmul.msk.bf16.gmra.mxu2 %vm1128_vm9, %v1081_v38 }
 0x1f0   : > { %1825 = vmatmul.msk.bf16.gmra.mxu1 %vm1128_vm9, %v1079_v33 }
 0x1f6   : > { %1814 = vmatmul.msk.bf16.gmra.mxu3 %vm1128_vm9, %v1122_v37  ;;  %1837 = vmatmul.msk.bf16.gmra.mxu2 %vm1128_vm9, %v1122_v37 }
 0x200   : > { %1826 = vmatmul.msk.bf16.gmra.mxu1 %vm1128_vm9, %v1081_v38 }
 0x206   : > { %1838 = vmatmul.msk.bf16.gmra.mxu2 %vm1128_vm9, %v1297_v11 }
 0x209   : > { %v1158_v42 = vpop.f32.mrf.mxu3 }
 0x20d   : > { %v1217_v60 = vpop.f32.mrf.mxu1 }
 0x20e   : > { %v1218_v48 = vadd.f32 %v1217_v60, %v1158_v42 }
 0x211   : > { %v1160_v43 = vpop.f32.mrf.mxu3 }
 0x215   : > { %v1219_v44 = vpop.f32.mrf.mxu1 }
 0x216   : > { %v1220_v17 = vadd.f32 %v1219_v44, %v1160_v43 }
 0x219   : > { %v1163_v46 = vpop.f32.mrf.mxu3  ;;  %v1317_v21 = vpop.f32.mrf.mxu2 }
 0x21a   : > { %v1357_v51 = vadd.f32 %v1317_v21, %v1218_v48 }
 0x21c   : > { %v1376_v47 = vadd.f32 %v2908_v32, %v1357_v51 }
 0x21d   : > { %v1222_v50 = vpop.f32.mrf.mxu1 }
 0x21e   : > { %v1392_v62 = vmax.f32 %v1376_v47, 0.0  ;;  %v1223_v3 = vadd.f32 %v1222_v50, %v1163_v46 }
 0x221   : > { %v1165_v54 = vpop.f32.mrf.mxu3  ;;  %v1319_v55 = vpop.f32.mrf.mxu2 }
 0x222   : > { %v1358_v52 = vadd.f32 %v1319_v55, %v1220_v17 }
 0x224   : > { %v1377_v56 = vadd.f32 %v2908_v32, %v1358_v52 }
 0x225   : > { %v1224_v61 = vpop.f32.mrf.mxu1 }
 0x226   : > { %v1393_v49 = vmax.f32 %v1377_v56, 0.0  ;;  %v1225_v8 = vadd.f32 %v1224_v61, %v1165_v54 }
 0x228   : > { %v1408_v58 = vpack.c.bf16 %v1393_v49, %v1392_v62 }
 0x229   : > { %v1168_v0 = vpop.f32.mrf.mxu3  ;;  %v1322_v1 = vpop.f32.mrf.mxu2 }
 0x22a   : > { %1839 = vmatmul.msk.bf16.vlgmr.msrb.gmra.mxu0 %vm1048_vm7, %v1408_v58  ;;  %v1359_v7 = vadd.f32 %v1322_v1, %v1223_v3 }
 0x22c   : > { %v1378_v13 = vadd.f32 %v2908_v32, %v1359_v7 }
 0x22d   : > { %v1227_v6 = vpop.f32.mrf.mxu1 }
 0x22e   : > { %v1394_v16 = vmax.f32 %v1378_v13, 0.0  ;;  %v1228_v22 = vadd.f32 %v1227_v6, %v1168_v0 }
 0x231   : > { %v1170_v10 = vpop.f32.mrf.mxu3  ;;  %v1324_v12 = vpop.f32.mrf.mxu2 }
 0x232   : > { %v1360_v14 = vadd.f32 %v1324_v12, %v1225_v8 }
 0x234   : > { %v1379_v15 = vadd.f32 %v2908_v32, %v1360_v14 }
 0x235   : > { %v1229_v45 = vpop.f32.mrf.mxu1 }
 0x236   : > { %v1395_v53 = vmax.f32 %v1379_v15, 0.0  ;;  %v1230_v24 = vadd.f32 %v1229_v45, %v1170_v10 }
 0x238   : > { %v1409_v19 = vpack.c.bf16 %v1395_v53, %v1394_v16 }
 0x239   : > { %v1173_v20 = vpop.f32.mrf.mxu3  ;;  %v1327_v9 = vpop.f32.mrf.mxu2 }
 0x23a   : > { %1840 = vmatmul.msk.bf16.gmra.mxu0 %vm1048_vm7, %v1409_v19  ;;  %v1361_v23 = vadd.f32 %v1327_v9, %v1228_v22 }
 0x23c   : > { %v1380_v29 = vadd.f32 %v2908_v32, %v1361_v23 }
 0x23d   : > { %v1232_v57 = vpop.f32.mrf.mxu1 }
 0x23e   : > { %v1396_v31 = vmax.f32 %v1380_v29, 0.0  ;;  %v1233_v35 = vadd.f32 %v1232_v57, %v1173_v20 }
 0x241   : > { %v1175_v26 = vpop.f32.mrf.mxu3  ;;  %v1329_v63 = vpop.f32.mrf.mxu2 }
 0x242   : > { %v1362_v25 = vadd.f32 %v1329_v63, %v1230_v24 }
 0x244   : > { %v1381_v30 = vadd.f32 %v2908_v32, %v1362_v25 }
 0x245   : > { %v1234_v2 = vpop.f32.mrf.mxu1 }
 0x246   : > { %v1397_v27 = vmax.f32 %v1381_v30, 0.0  ;;  %v1235_v38 = vadd.f32 %v1234_v2, %v1175_v26 }
 0x248   : > { %v1410_v33 = vpack.c.bf16 %v1397_v27, %v1396_v31 }
 0x249   : > { %v1178_v59 = vpop.f32.mrf.mxu3  ;;  %v1332_v34 = vpop.f32.mrf.mxu2 }
 0x24a   : > { %1841 = vmatmul.msk.bf16.gmra.mxu0 %vm1048_vm7, %v1410_v33  ;;  %v1363_v18 = vadd.f32 %v1332_v34, %v1233_v35 }
 0x24c   : > { %v1382_v39 = vadd.f32 %v2908_v32, %v1363_v18 }
 0x24d   : > { %v1237_v5 = vpop.f32.mrf.mxu1 }
 0x24e   : > { %v1398_v41 = vmax.f32 %v1382_v39, 0.0  ;;  %v1238_v43 = vadd.f32 %v1237_v5, %v1178_v59 }
 0x251   : > { %v1334_v36 = vpop.f32.mrf.mxu2  ;;  %v1180_v37 = vpop.f32.mrf.mxu3 }
 0x252   : > { %v1364_v28 = vadd.f32 %v1334_v36, %v1235_v38 }
 0x254   : > { %v1383_v4 = vadd.f32 %v2908_v32, %v1364_v28  ;;  %v496_v28 = vld [vmem:[%s2562_s26] sm:$0xff]  }
 0x255   : > { %v1239_v40 = vpop.f32.mrf.mxu1 }
 0x256   : > { %v1399_v11 = vmax.f32 %v1383_v4, 0.0  ;;  %v1240_v48 = vadd.f32 %v1239_v40, %v1180_v37  ;;  %v2938_v37 = vld [vmem:[%s3143_s21] ss:$0 sm:$0xff]  ;;  %v1496_v4 = vunpack.c.l.bf16 %v496_v28 }
 0x258   : > { %v1411_v42 = vpack.c.bf16 %v1399_v11, %v1398_v41 }
 0x259   : > { %v1337_v60 = vpop.f32.mrf.mxu2  ;;  %v1183_v46 = vpop.f32.mrf.mxu3 }
 0x25a   : > { %1842 = vmatmul.msk.bf16.gmra.mxu0 %vm1048_vm7, %v1411_v42  ;;  %v1365_v21 = vadd.f32 %v1337_v60, %v1238_v43 }
 0x25c   : > { %v1384_v51 = vadd.f32 %v2908_v32, %v1365_v21 }
 0x25d   : > { %v1242_v44 = vpop.f32.mrf.mxu1 }
 0x25e   : > { %v1400_v47 = vmax.f32 %v1384_v51, 0.0  ;;  %v1243_v49 = vadd.f32 %v1242_v44, %v1183_v46  ;;  %v498_v46 = vld [vmem:[%s2562_s26 + $0x8] sm:$0xff]  }
 0x261   : > { %v1339_v50 = vpop.f32.mrf.mxu2  ;;  %v1185_v56 = vpop.f32.mrf.mxu3 }
 0x262   : > { %v1366_v17 = vadd.f32 %v1339_v50, %v1240_v48  ;;  %v1498_v48 = vunpack.c.l.bf16 %v498_v46 }
 0x264   : > { %v1385_v54 = vadd.f32 %v2908_v32, %v1366_v17 }
 0x265   : > { %v1244_v55 = vpop.f32.mrf.mxu1 }
 0x266   : > { %v1401_v52 = vmax.f32 %v1385_v54, 0.0  ;;  %v1245_v1 = vadd.f32 %v1244_v55, %v1185_v56  ;;  %v1499_v55 = vunpack.c.h.bf16 %v498_v46 }
 0x268   : > { %v1412_v61 = vpack.c.bf16 %v1401_v52, %v1400_v47 }
 0x269   : > { %v1342_v62 = vpop.f32.mrf.mxu2  ;;  %v1188_v3 = vpop.f32.mrf.mxu3 }
 0x26a   : > { %1843 = vmatmul.msk.bf16.gmra.mxu0 %vm1048_vm7, %v1412_v61  ;;  %v1367_v58 = vadd.f32 %v1342_v62, %v1243_v49  ;;  %v500_v61 = vld [vmem:[%s2562_s26 + $0x10] sm:$0xff]  }
 0x26b   : > { %v1500_v49 = vunpack.c.l.bf16 %v500_v61 }
 0x26c   : > { %v1386_v7 = vadd.f32 %v2908_v32, %v1367_v58 }
 0x26d   : > { %v1247_v0 = vpop.f32.mrf.mxu1 }
 0x26e   : > { %v1402_v12 = vmax.f32 %v1386_v7, 0.0  ;;  %v1248_v53 = vadd.f32 %v1247_v0, %v1188_v3 }
 0x271   : > { %v1344_v6 = vpop.f32.mrf.mxu2  ;;  %v1190_v16 = vpop.f32.mrf.mxu3 }
 0x272   : > { %v1368_v8 = vadd.f32 %v1344_v6, %v1245_v1  ;;  %v1501_v6 = vunpack.c.h.bf16 %v500_v61 }
 0x274   : > { %v1387_v10 = vadd.f32 %v2908_v32, %v1368_v8 }
 0x275   : > { %v1249_v15 = vpop.f32.mrf.mxu1 }
 0x276   : > { %v1403_v13 = vmax.f32 %v1387_v10, 0.0  ;;  %v1250_v20 = vadd.f32 %v1249_v15, %v1190_v16 }
 0x278   : > { %v1413_v14 = vpack.c.bf16 %v1403_v13, %v1402_v12  ;;  %v502_v12 = vld [vmem:[%s2562_s26 + $0x18] sm:$0xff]  }
 0x279   : > { %v1347_v45 = vpop.f32.mrf.mxu2  ;;  %v1193_v26 = vpop.f32.mrf.mxu3 }
 0x27a   : > { %1844 = vmatmul.msk.bf16.gmra.mxu0 %vm1048_vm7, %v1413_v14  ;;  %v1369_v19 = vadd.f32 %v1347_v45, %v1248_v53  ;;  %v1502_v14 = vunpack.c.l.bf16 %v502_v12 }
 0x27c   : > { %v1388_v22 = vadd.f32 %v2908_v32, %v1369_v19  ;;  %v1503_v19 = vunpack.c.h.bf16 %v502_v12 }
 0x27d   : > { %v1252_v23 = vpop.f32.mrf.mxu1 }
 0x27e   : > { %v1404_v63 = vmax.f32 %v1388_v22, 0.0  ;;  %v1253_v2 = vadd.f32 %v1252_v23, %v1193_v26 }
 0x281   : > { %v1349_v9 = vpop.f32.mrf.mxu2  ;;  %v1195_v33 = vpop.f32.mrf.mxu3 }
 0x282   : > { %v1370_v57 = vadd.f32 %v1349_v9, %v1250_v20 }
 0x284   : > { %v1389_v24 = vadd.f32 %v2908_v32, %v1370_v57  ;;  %v504_v57 = vld [vmem:[%s2562_s26 + $0x20] sm:$0xff]  }
 0x285   : > { %v1254_v31 = vpop.f32.mrf.mxu1 }
 0x286   : > { %v1405_v29 = vmax.f32 %v1389_v24, 0.0  ;;  %v1255_v59 = vadd.f32 %v1254_v31, %v1195_v33  ;;  %v1504_v24 = vunpack.c.l.bf16 %v504_v57  ;;  %v506_v33 = vld [vmem:[%s2562_s26 + $0x28] sm:$0xff]  }
 0x288   : > { %v1414_v25 = vpack.c.bf16 %v1405_v29, %v1404_v63 }
 0x289   : > { %v1352_v30 = vpop.f32.mrf.mxu2 }
 0x28a   : > { %1845 = vmatmul.msk.bf16.gmra.mxu0 %vm1048_vm7, %v1414_v25  ;;  %v1371_v27 = vadd.f32 %v1352_v30, %v1253_v2  ;;  %v1505_v30 = vunpack.c.h.bf16 %v504_v57 }
 0x28c   : > { %v1390_v35 = vadd.f32 %v2908_v32, %v1371_v27 }
 0x28e   : > { %v1406_v38 = vmax.f32 %v1390_v35, 0.0 }
 0x291   : > { %v1354_v34 = vpop.f32.mrf.mxu2 }
 0x292   : > { %v1372_v5 = vadd.f32 %v1354_v34, %v1255_v59  ;;  %v1506_v34 = vunpack.c.l.bf16 %v506_v33 }
 0x294   : > { %v1391_v18 = vadd.f32 %v2908_v32, %v1372_v5  ;;  %v1497_v32 = vunpack.c.h.bf16 %v496_v28 }
 0x296   : > { %v1407_v36 = vmax.f32 %v1391_v18, 0.0 }
 0x298   : > { %v1415_v39 = vpack.c.bf16 %v1407_v36, %v1406_v38  ;;  %v1507_v36 = vunpack.c.h.bf16 %v506_v33 }
 0x29a   : > { %1846 = vmatmul.msk.bf16.gmra.mxu0 %vm1048_vm7, %v1415_v39 }
 0x2a7   : > { %v1456_v40 = vpop.f32.mrf.mxu0 }
 0x2a8   : > { %v1457_v41 = vadd.f32 %v2938_v37, %v1456_v40  ;;  %v508_v40 = vld [vmem:[%s2562_s26 + $0x30] sm:$0xff]  }
 0x2aa   : > { %v1512_v11 = vadd.f32 %v1496_v4, %v1457_v41 }
 0x2ac   : > { %v1528_v42 = vmax.f32 %v1512_v11, 0.0  ;;  %v1508_v11 = vunpack.c.l.bf16 %v508_v40 }
 0x2ae   : > { %1544 = vst.msk [vmem:[%s2942_s19] sm:$0xff] %vm577_vm0, %v1528_v42 }
 0x2af   : > { %v1458_v60 = vpop.f32.mrf.mxu0 }
 0x2b0   : > { %v1459_v43 = vadd.f32 %v2938_v37, %v1458_v60 }
 0x2b2   : > { %v1513_v44 = vadd.f32 %v1497_v32, %v1459_v43 }
 0x2b4   : > { %v1529_v21 = vmax.f32 %v1513_v44, 0.0  ;;  %v1509_v44 = vunpack.c.h.bf16 %v508_v40 }
 0x2b6   : > { %1545 = vst.msk [vmem:[%s2942_s19 + $0x8] sm:$0xff] %vm577_vm0, %v1529_v21 }
 0x2b7   : > { %v1461_v50 = vpop.f32.mrf.mxu0 }
 0x2b8   : > { %v1462_v51 = vadd.f32 %v2938_v37, %v1461_v50  ;;  %v510_v50 = vld [vmem:[%s2562_s26 + $0x38] sm:$0xff]  }
 0x2ba   : > { %v1514_v17 = vadd.f32 %v1498_v48, %v1462_v51 }
 0x2bc   : > { %v1530_v54 = vmax.f32 %v1514_v17, 0.0  ;;  %v1510_v17 = vunpack.c.l.bf16 %v510_v50 }
 0x2be   : > { %1546 = vst.msk [vmem:[%s2942_s19 + $0x10] sm:$0xff] %vm577_vm0, %v1530_v54 }
 0x2bf   : > { %v1463_v47 = vpop.f32.mrf.mxu0 }
 0x2c0   : > { %v1464_v52 = vadd.f32 %v2938_v37, %v1463_v47 }
 0x2c2   : > { %v1515_v56 = vadd.f32 %v1499_v55, %v1464_v52 }
 0x2c4   : > { %v1531_v62 = vmax.f32 %v1515_v56, 0.0  ;;  %v1511_v56 = vunpack.c.h.bf16 %v510_v50 }
 0x2c6   : > { %1547 = vst.msk [vmem:[%s2942_s19 + $0x18] sm:$0xff] %vm577_vm0, %v1531_v62 }
 0x2c7   : > { %v1466_v58 = vpop.f32.mrf.mxu0 }
 0x2c8   : > { %v1467_v0 = vadd.f32 %v2938_v37, %v1466_v58 }
 0x2ca   : > { %v1516_v1 = vadd.f32 %v1500_v49, %v1467_v0 }
 0x2cc   : > { %v1532_v3 = vmax.f32 %v1516_v1, 0.0 }
 0x2ce   : > { %1548 = vst.msk [vmem:[%s2942_s19 + $0x20] sm:$0xff] %vm577_vm0, %v1532_v3 }
 0x2cf   : > { %v1468_v7 = vpop.f32.mrf.mxu0 }
 0x2d0   : > { %v1469_v8 = vadd.f32 %v2938_v37, %v1468_v7 }
 0x2d2   : > { %v1517_v10 = vadd.f32 %v1501_v6, %v1469_v8 }
 0x2d4   : > { %v1533_v13 = vmax.f32 %v1517_v10, 0.0 }
 0x2d6   : > { %1549 = vst.msk [vmem:[%s2942_s19 + $0x28] sm:$0xff] %vm577_vm0, %v1533_v13 }
 0x2d7   : > { %v1471_v15 = vpop.f32.mrf.mxu0 }
 0x2d8   : > { %v1472_v45 = vadd.f32 %v2938_v37, %v1471_v15 }
 0x2da   : > { %v1518_v16 = vadd.f32 %v1502_v14, %v1472_v45 }
 0x2dc   : > { %v1534_v53 = vmax.f32 %v1518_v16, 0.0 }
 0x2de   : > { %1550 = vst.msk [vmem:[%s2942_s19 + $0x30] sm:$0xff] %vm577_vm0, %v1534_v53 }
 0x2df   : > { %v1473_v20 = vpop.f32.mrf.mxu0 }
 0x2e0   : > { %v1474_v9 = vadd.f32 %v2938_v37, %v1473_v20 }
 0x2e2   : > { %v1519_v22 = vadd.f32 %v1503_v19, %v1474_v9 }
 0x2e4   : > { %v1535_v23 = vmax.f32 %v1519_v22, 0.0 }
 0x2e6   : > { %1551 = vst.msk [vmem:[%s2942_s19 + $0x38] sm:$0xff] %vm577_vm0, %v1535_v23 }
 0x2e7   : > { %v1476_v26 = vpop.f32.mrf.mxu0 }
 0x2e8   : > { %v1477_v63 = vadd.f32 %v2938_v37, %v1476_v26 }
 0x2ea   : > { %v1520_v29 = vadd.f32 %v1504_v24, %v1477_v63 }
 0x2ec   : > { %v1536_v25 = vmax.f32 %v1520_v29, 0.0 }
 0x2ee   : > { %1552 = vst.msk [vmem:[%s2942_s19 + $0x40] sm:$0xff] %vm577_vm0, %v1536_v25 }
 0x2ef   : > { %v1478_v2 = vpop.f32.mrf.mxu0 }
 0x2f0   : > { %v1479_v31 = vadd.f32 %v2938_v37, %v1478_v2 }
 0x2f2   : > { %v1521_v27 = vadd.f32 %v1505_v30, %v1479_v31 }
 0x2f4   : > { %v1537_v59 = vmax.f32 %v1521_v27, 0.0 }
 0x2f6   : > { %1553 = vst.msk [vmem:[%s2942_s19 + $0x48] sm:$0xff] %vm577_vm0, %v1537_v59 }
 0x2f7   : > { %v1481_v35 = vpop.f32.mrf.mxu0 }
 0x2f8   : > { %v1482_v5 = vadd.f32 %v2938_v37, %v1481_v35 }
 0x2fa   : > { %v1522_v18 = vadd.f32 %v1506_v34, %v1482_v5 }
 0x2fc   : > { %v1538_v38 = vmax.f32 %v1522_v18, 0.0 }
 0x2fe   : > { %1554 = vst.msk [vmem:[%s2942_s19 + $0x50] sm:$0xff] %vm577_vm0, %v1538_v38 }
 0x2ff   : > { %v1483_v39 = vpop.f32.mrf.mxu0 }
 0x300   : > { %v1484_v28 = vadd.f32 %v2938_v37, %v1483_v39 }
 0x302   : > { %v1523_v4 = vadd.f32 %v1507_v36, %v1484_v28 }
 0x304   : > { %v1539_v41 = vmax.f32 %v1523_v4, 0.0 }
 0x306   : > { %1555 = vst.msk [vmem:[%s2942_s19 + $0x58] sm:$0xff] %vm577_vm0, %v1539_v41 }
 0x307   : > { %v1486_v42 = vpop.f32.mrf.mxu0 }
 0x308   : > { %v1487_v32 = vadd.f32 %v2938_v37, %v1486_v42 }
 0x30a   : > { %v1524_v60 = vadd.f32 %v1508_v11, %v1487_v32 }
 0x30c   : > { %v1540_v43 = vmax.f32 %v1524_v60, 0.0 }
 0x30e   : > { %1556 = vst.msk [vmem:[%s2942_s19 + $0x60] sm:$0xff] %vm577_vm0, %v1540_v43 }
 0x30f   : > { %v1488_v46 = vpop.f32.mrf.mxu0 }
 0x310   : > { %v1489_v21 = vadd.f32 %v2938_v37, %v1488_v46 }
 0x312   : > { %v1525_v48 = vadd.f32 %v1509_v44, %v1489_v21 }
 0x314   : > { %v1541_v51 = vmax.f32 %v1525_v48, 0.0 }
 0x316   : > { %1557 = vst.msk [vmem:[%s2942_s19 + $0x68] sm:$0xff] %vm577_vm0, %v1541_v51 }
 0x317   : > { %v1491_v54 = vpop.f32.mrf.mxu0 }
 0x318   : > { %v1492_v55 = vadd.f32 %v2938_v37, %v1491_v54 }
 0x31a   : > { %v1526_v47 = vadd.f32 %v1510_v17, %v1492_v55 }
 0x31c   : > { %v1542_v52 = vmax.f32 %v1526_v47, 0.0 }
 0x31e   : > { %1558 = vst.msk [vmem:[%s2942_s19 + $0x70] sm:$0xff] %vm577_vm0, %v1542_v52 }
 0x31f   : > { %v1493_v61 = vpop.f32.mrf.mxu0 }
 0x320   : > { %v1494_v62 = vadd.f32 %v2938_v37, %v1493_v61 }
 0x322   : > { %v1527_v49 = vadd.f32 %v1511_v56, %v1494_v62 }
 0x324   : > { %v1543_v58 = vmax.f32 %v1527_v49, 0.0 }
 0x326   : > { %1559 = vst.msk [vmem:[%s2942_s19 + $0x78] sm:$0xff] %vm577_vm0, %v1543_v58 }
 0x327   : > { %2139 = shalt.err (!%p2136_p12)
}
 0x328   : > { %s2272_s25 = smov 128  }
 0x329   : > { %1884 = dma.vmem_to_hbm [thread:$0]  (%p2494_p4), %s1577_s12, 2048, %s1579_s28, %s1561_s6, %s2272_s25, %s2272_s25, %s2271_s0  }
 0x32a PF: > { %s3146_s19 = sld [smem:[#allocation14_spill]]  ;;  %p1901_p13 = scmp.ge.s32.totalorder %s2266_s22, 2 }
 0x32c   : > { %p1897_p1 = pnand %p1901_p13, %p2498_p6 }
 0x32e   : > { %p1898_p2 = pneg %p1897_p1 }
 0x330   : > { %s1593_s18 = sand.u32 1, %s3146_s19  }
 0x331   : > { %s1594_s23 = scalar_lea.sflag [#allocation4], %s1593_s18 }
 0x332   : > { %2209 = dma.done.wait (%p1898_p2), %s1594_s23, 2048  }
 0x333   : > { %2211 = vsyncadd (%p1898_p2), %s1594_s23, 4294965248  ;;  %s28_s22 = sadd.s32 1, %s2266_s22   ;;  %s3149_s8 = sld [smem:[#allocation13_spill]] }
 0x334   : > { %p3021_p11 = scmp.ge.s32.totalorder %s28_s22, 6   ;;  %s3150_s14 = sld [smem:[#allocation23_spill]] }
 0x335   : > { %s3151_s0 = sld [smem:[#allocation15_spill]]  ;;  %s3157_s30 = smov %s2218_s10 }
 0x336   : > { %s3152_s17 = sld [smem:[#allocation24_spill]]  ;;  %s3158_s10 = smov %s2222_s11 }
 0x337   : > { %s3153_s18 = sld [smem:[#allocation18_spill]]  ;;  %s3159_s11 = smov %s2541_s29 }
 0x338   : > { %s3154_s19 = sld [smem:[#allocation19_spill]]  ;;  %s3160_s12 = smov %s2230_s13 }
 0x339   : > { %s3155_s20 = sld [smem:[#allocation20_spill]]  ;;  %s3161_s13 = smov %s3149_s8 }
 0x33a   : > { %s3156_s21 = sld [smem:[#allocation21_spill]]  ;;  %s3162_s15 = smov %s2242_s16 }
 0x33b   : > { %s3163_s16 = smov %s3151_s0  ;;  %27 = sbr.rel (!%p3021_p11) target bundleno = 22 (0x16), region = 125 }
 0x340   :  { %1600 = vsyncpa [#allocation3], 1 }
 0x341   :  { %1602 = vsyncpa [#allocation3 + $0x1], 1 }
 0x342   :  { %1603 = vsyncpa [#allocation6], 1 }
 0x343   :  { %1605 = vsyncpa [#allocation6 + $0x1], 1 }
 0x344   :  { %1606 = vsyncpa [#allocation4], 1 }
 0x345   :  { %1608 = vsyncpa [#allocation4 + $0x1], 1 }

</bundles_post_ra>
